<compile_context>
chip_gen: v6e
topology: v6e:2x2x1
jax: 0.10.0
libtpu: 0.0.40
codegen_flags: <defaults>
</compile_context>

<pallas_src>
import jax
import jax.numpy as jnp
from jax.experimental import pallas as pl
from jax.experimental.pallas import tpu as pltpu

# ---- config -----------------------------------------------------------------
VOCAB = 50
MAX_POS = 16
DIM = 64
N_HEADS = 4
HEAD_DIM = DIM // N_HEADS
FFN = 128
N_LAYERS = 2
LN_EPS = 1e-12  # DistilBERT LayerNorm eps


# ---- in-kernel helpers --------------------------------------------------------
def _layernorm(x, g, b, eps=LN_EPS):
    # Single-pass statistics: var = E[x^2] - mu^2 (two independent lane reduces).
    mu = jnp.mean(x, axis=-1, keepdims=True)
    msq = jnp.mean(x * x, axis=-1, keepdims=True)
    var = jnp.maximum(msq - mu * mu, 0.0)
    return (x - mu) * jax.lax.rsqrt(var + eps) * g + b


# ---- fused encoder kernel -----------------------------------------------------
def encoder_kernel(x_ref, bias_ref, emb_ln_ref, w_qkv_ref, vec_ref, b1_ref,
                   w_o_ref, w1_ref, w2_ref, cls_ref):
    # x_ref:      (B*S, D)      f32   word+pos embeddings (pre-LayerNorm)
    # bias_ref:   (B, 1, S)     f32   additive attention bias (0 keep / -1e9 masked)
    # emb_ln_ref: (2, 1, D)     f32   [gamma, beta] of the embedding LayerNorm
    # w_qkv_ref:  (L, 3, D, D)  bf16  per-layer [Wq*scale, Wk, Wv]
    # vec_ref:    (L, 9, D)     f32   rows: bq*scale, bk, bv, bo, ln1_g, ln1_b,
    #                                       b2, ln2_g, ln2_b
    # b1_ref:     (L, 1, FFN)   f32
    # w_o_ref:    (L, H, hd, D) bf16  head-split output projection
    # w1_ref:     (L, D, FFN)   bf16 ; w2_ref: (L, FFN, D) bf16
    # cls_ref:    (B, D)        f32   output (CLS token hidden state)
    BS, D = x_ref.shape
    B = bias_ref.shape[0]
    S = bias_ref.shape[2]
    L = w_qkv_ref.shape[0]

    bias = bias_ref[...]                                         # (B, 1, S)
    # embedding LayerNorm fused in (no HBM round trip)
    x = _layernorm(x_ref[...], emb_ln_ref[0], emb_ln_ref[1])     # (BS, D) f32

    for l in range(L):                                           # static unroll
        vecs = vec_ref[l]                                        # (9, D) f32
        bq, bk, bv = vecs[0:1], vecs[1:2], vecs[2:3]
        bo, g1, be1 = vecs[3:4], vecs[4:5], vecs[5:6]
        b2, g2, be2 = vecs[6:7], vecs[7:8], vecs[8:9]
        wqkv = w_qkv_ref[l]                                      # (3, D, D) bf16
        w_o = w_o_ref[l]                                         # (H, hd, D) bf16

        # ---- Q/K/V: leading-axis split (no lane-unaligned slicing), scale
        #      already folded into Wq/bq at init time.
        xb = x.astype(jnp.bfloat16)
        q = (jnp.dot(xb, wqkv[0], preferred_element_type=jnp.float32)
             + bq).reshape(B, S, D).astype(jnp.bfloat16)
        k = (jnp.dot(xb, wqkv[1], preferred_element_type=jnp.float32)
             + bk).reshape(B, S, D).astype(jnp.bfloat16)
        v = (jnp.dot(xb, wqkv[2], preferred_element_type=jnp.float32)
             + bv).reshape(B, S, D).astype(jnp.bfloat16)

        # ---- multi-head attention; each head's context goes straight through
        #      its slice of W_O (accumulate) -> no lane concatenate.
        acc = jnp.zeros((BS, D), jnp.float32)
        for h in range(N_HEADS):                                 # static unroll
            lo, hi = h * HEAD_DIM, (h + 1) * HEAD_DIM
            s = jnp.einsum('bqd,bkd->bqk', q[:, :, lo:hi], k[:, :, lo:hi],
                           preferred_element_type=jnp.float32)    # (B, S, S)
            s = s + bias                                           # additive mask
            s = s - jnp.max(s, axis=-1, keepdims=True)
            e = jnp.exp(s)
            p = e * pl.reciprocal(jnp.sum(e, axis=-1, keepdims=True), approx=True)
            ctx = jnp.einsum('bqk,bkd->bqd', p.astype(jnp.bfloat16),
                             v[:, :, lo:hi],
                             preferred_element_type=jnp.float32)   # (B, S, hd)
            acc = acc + jnp.dot(ctx.reshape(BS, HEAD_DIM).astype(jnp.bfloat16),
                                w_o[h], preferred_element_type=jnp.float32)

        # ---- attention output bias + sa_layer_norm ----
        h1 = _layernorm(x + acc + bo, g1, be1)

        # ---- FFN (tanh-approx GELU) + output_layer_norm ----
        f = jnp.dot(h1.astype(jnp.bfloat16), w1_ref[l],
                    preferred_element_type=jnp.float32) + b1_ref[l]
        f = jax.nn.gelu(f, approximate=True)
        f = jnp.dot(f.astype(jnp.bfloat16), w2_ref[l],
                    preferred_element_type=jnp.float32) + b2
        x = _layernorm(h1 + f, g2, be2)

    # only the CLS rows go back to HBM
    cls_ref[...] = x.reshape(B, S, D)[:, 0, :]


# ---- parameters (packed / stacked for few DMA streams) ------------------------
def init_params(key):
    std = 0.02
    scale = 1.0 / (float(HEAD_DIM) ** 0.5)
    keys = iter(jax.random.split(key, 2 + 6 * N_LAYERS))
    word_emb = std * jax.random.normal(next(keys), (VOCAB, DIM), jnp.float32)
    pos_emb = std * jax.random.normal(next(keys), (MAX_POS, DIM), jnp.float32)
    emb_ln = jnp.stack([jnp.ones((1, DIM), jnp.float32),
                        jnp.zeros((1, DIM), jnp.float32)])          # (2, 1, D)

    w_qkv, vec_d, b1, w_o, w1, w2 = [], [], [], [], [], []
    for _ in range(N_LAYERS):
        wq = std * jax.random.normal(next(keys), (DIM, DIM), jnp.float32)
        wk = std * jax.random.normal(next(keys), (DIM, DIM), jnp.float32)
        wv = std * jax.random.normal(next(keys), (DIM, DIM), jnp.float32)
        wo = std * jax.random.normal(next(keys), (DIM, DIM), jnp.float32)
        w1_ = std * jax.random.normal(next(keys), (DIM, FFN), jnp.float32)
        w2_ = std * jax.random.normal(next(keys), (FFN, DIM), jnp.float32)
        bq = jnp.zeros((DIM,), jnp.float32)
        bk = jnp.zeros((DIM,), jnp.float32)
        bv = jnp.zeros((DIM,), jnp.float32)
        bo = jnp.zeros((DIM,), jnp.float32)
        b2_ = jnp.zeros((DIM,), jnp.float32)
        # one-time weight-side fold of the attention score scale into Q
        w_qkv.append(jnp.stack([wq * scale, wk, wv]))               # (3, D, D)
        vec_d.append(jnp.stack([bq * scale, bk, bv, bo,
                                jnp.ones(DIM, jnp.float32),          # sa LN gamma
                                jnp.zeros(DIM, jnp.float32),         # sa LN beta
                                b2_,
                                jnp.ones(DIM, jnp.float32),          # out LN gamma
                                jnp.zeros(DIM, jnp.float32)]))       # out LN beta
        b1.append(jnp.zeros((1, FFN), jnp.float32))
        w_o.append(wo.reshape(N_HEADS, HEAD_DIM, DIM))              # head-split
        w1.append(w1_)
        w2.append(w2_)

    return {
        'word_emb': word_emb,
        'pos_emb': pos_emb,
        'emb_ln': emb_ln,
        'w_qkv': jnp.stack(w_qkv).astype(jnp.bfloat16),  # (L, 3, D, D)
        'vec_d': jnp.stack(vec_d).astype(jnp.float32),   # (L, 9, D)
        'b1': jnp.stack(b1),                             # (L, 1, FFN)
        'w_o': jnp.stack(w_o).astype(jnp.bfloat16),      # (L, H, hd, D)
        'w1': jnp.stack(w1).astype(jnp.bfloat16),        # (L, D, FFN)
        'w2': jnp.stack(w2).astype(jnp.bfloat16),        # (L, FFN, D)
    }


# ---- forward (TextEncoder.forward equivalent) ---------------------------------
def text_encoder_forward(params, input_ids, attention_mask=None):
    B, S = input_ids.shape
    if attention_mask is None:
        attention_mask = jnp.ones((B, S), dtype=jnp.float32)
    # embeddings: word + position (gather is plain-JAX glue outside the kernel)
    # TODO(synk): dropout layers are omitted (frozen / eval-mode semantics).
    word = jnp.take(params['word_emb'], input_ids, axis=0)          # (B, S, D)
    pos = params['pos_emb'][:S][None, :, :]                         # (1, S, D)
    x = (word + pos).astype(jnp.float32).reshape(B * S, DIM)        # batch folded
    bias = ((attention_mask.astype(jnp.float32) - 1.0) * 1e9).reshape(B, 1, S)

    vmem_spec = lambda: pl.BlockSpec(memory_space=pltpu.MemorySpace.VMEM)
    cls = pl.pallas_call(
        encoder_kernel,
        out_shape=jax.ShapeDtypeStruct((B, DIM), jnp.float32),
        in_specs=[vmem_spec() for _ in range(9)],
        out_specs=vmem_spec(),
        compiler_params=pltpu.CompilerParams(
            vmem_limit_bytes=32 * 1024 * 1024),
    )(x, bias, params['emb_ln'], params['w_qkv'], params['vec_d'],
      params['b1'], params['w_o'], params['w1'], params['w2'])
    return cls                                  # (B, D) == last_hidden_state[:, 0, :]


# ---- main ---------------------------------------------------------------------
if __name__ == "__main__":
    key = jax.random.PRNGKey(0)
    k_param, k_ids = jax.random.split(key)

    B, S = 2, 8
    params = init_params(k_param)
    input_ids = jax.random.randint(k_ids, (B, S), 0, VOCAB, dtype=jnp.int32)
    attention_mask = jnp.ones((B, S), dtype=jnp.float32)
    attention_mask = attention_mask.at[1, -2:].set(0.0)  # exercise masking

    forward = jax.jit(text_encoder_forward)
    out = jax.block_until_ready(forward(params, input_ids, attention_mask))
    assert out.shape == (B, DIM) and out.dtype == jnp.float32
    assert bool(jnp.all(jnp.isfinite(out)))
    print("KERNEL_OK")
</pallas_src>

<mosaic_0001>
module attributes {stable_mosaic.version = 11 : i64} {
  func.func @encoder_kernel(%arg0: memref<16x64xf32, #tpu.memory_space<vmem>>, %arg1: memref<2x1x8xf32, #tpu.memory_space<vmem>>, %arg2: memref<2x1x64xf32, #tpu.memory_space<vmem>>, %arg3: memref<2x3x64x64xbf16, #tpu.memory_space<vmem>>, %arg4: memref<2x9x64xf32, #tpu.memory_space<vmem>>, %arg5: memref<2x1x128xf32, #tpu.memory_space<vmem>>, %arg6: memref<2x4x16x64xbf16, #tpu.memory_space<vmem>>, %arg7: memref<2x64x128xbf16, #tpu.memory_space<vmem>>, %arg8: memref<2x128x64xbf16, #tpu.memory_space<vmem>>, %arg9: memref<2x64xf32, #tpu.memory_space<vmem>>) attributes {dimension_semantics = [], scalar_prefetch = 0 : i64, scratch_operands = 0 : i64, tpu.core_type = #tpu.core_type<tc>} {
    %c0 = arith.constant 0 : index
    %c0_0 = arith.constant 0 : index
    %c0_1 = arith.constant 0 : index
    %0 = vector.load %arg1[%c0, %c0_0, %c0_1] : memref<2x1x8xf32, #tpu.memory_space<vmem>>, vector<2x1x8xf32>
    %c0_2 = arith.constant 0 : index
    %c0_3 = arith.constant 0 : index
    %1 = vector.load %arg0[%c0_2, %c0_3] : memref<16x64xf32, #tpu.memory_space<vmem>>, vector<16x64xf32>
    %c0_4 = arith.constant 0 : index
    %c0_5 = arith.constant 0 : index
    %c0_6 = arith.constant 0 : index
    %2 = vector.load %arg2[%c0_4, %c0_5, %c0_6] : memref<2x1x64xf32, #tpu.memory_space<vmem>>, vector<1x1x64xf32>
    %3 = vector.shape_cast %2 : vector<1x1x64xf32> to vector<1x64xf32>
    %c1 = arith.constant 1 : index
    %c0_7 = arith.constant 0 : index
    %c0_8 = arith.constant 0 : index
    %4 = vector.load %arg2[%c1, %c0_7, %c0_8] : memref<2x1x64xf32, #tpu.memory_space<vmem>>, vector<1x1x64xf32>
    %5 = vector.shape_cast %4 : vector<1x1x64xf32> to vector<1x64xf32>
    %cst = arith.constant dense<0.000000e+00> : vector<16xf32>
    %6 = vector.multi_reduction <add>, %1, %cst [1] : vector<16x64xf32> to vector<16xf32>
    %7 = vector.shape_cast %6 : vector<16xf32> to vector<16x1xf32>
    %cst_9 = arith.constant 6.400000e+01 : f32
    %8 = vector.broadcast %cst_9 : f32 to vector<16x1xf32>
    %9 = arith.divf %7, %8 : vector<16x1xf32>
    %10 = arith.mulf %1, %1 : vector<16x64xf32>
    %cst_10 = arith.constant dense<0.000000e+00> : vector<16xf32>
    %11 = vector.multi_reduction <add>, %10, %cst_10 [1] : vector<16x64xf32> to vector<16xf32>
    %12 = vector.shape_cast %11 : vector<16xf32> to vector<16x1xf32>
    %cst_11 = arith.constant 6.400000e+01 : f32
    %13 = vector.broadcast %cst_11 : f32 to vector<16x1xf32>
    %14 = arith.divf %12, %13 : vector<16x1xf32>
    %15 = arith.mulf %9, %9 : vector<16x1xf32>
    %16 = arith.subf %14, %15 : vector<16x1xf32>
    %cst_12 = arith.constant 0.000000e+00 : f32
    %17 = vector.broadcast %cst_12 : f32 to vector<16x1xf32>
    %18 = arith.maximumf %16, %17 : vector<16x1xf32>
    %19 = vector.broadcast %9 : vector<16x1xf32> to vector<16x64xf32>
    %20 = arith.subf %1, %19 : vector<16x64xf32>
    %cst_13 = arith.constant 9.99999996E-13 : f32
    %21 = vector.broadcast %cst_13 : f32 to vector<16x1xf32>
    %22 = arith.addf %18, %21 : vector<16x1xf32>
    %23 = math.rsqrt %22 : vector<16x1xf32>
    %24 = vector.broadcast %23 : vector<16x1xf32> to vector<16x64xf32>
    %25 = arith.mulf %20, %24 : vector<16x64xf32>
    %26 = vector.broadcast %3 : vector<1x64xf32> to vector<16x64xf32>
    %27 = arith.mulf %25, %26 : vector<16x64xf32>
    %28 = vector.broadcast %5 : vector<1x64xf32> to vector<16x64xf32>
    %29 = arith.addf %27, %28 : vector<16x64xf32>
    %c0_14 = arith.constant 0 : index
    %c0_15 = arith.constant 0 : index
    %c0_16 = arith.constant 0 : index
    %30 = vector.load %arg4[%c0_14, %c0_15, %c0_16] : memref<2x9x64xf32, #tpu.memory_space<vmem>>, vector<1x9x64xf32>
    %31 = vector.shape_cast %30 : vector<1x9x64xf32> to vector<9x64xf32>
    %32 = vector.extract_strided_slice %31 {offsets = [0, 0], sizes = [1, 64], strides = [1, 1]} : vector<9x64xf32> to vector<1x64xf32>
    %33 = vector.extract_strided_slice %31 {offsets = [1, 0], sizes = [1, 64], strides = [1, 1]} : vector<9x64xf32> to vector<1x64xf32>
    %34 = vector.extract_strided_slice %31 {offsets = [2, 0], sizes = [1, 64], strides = [1, 1]} : vector<9x64xf32> to vector<1x64xf32>
    %35 = vector.extract_strided_slice %31 {offsets = [3, 0], sizes = [1, 64], strides = [1, 1]} : vector<9x64xf32> to vector<1x64xf32>
    %36 = vector.extract_strided_slice %31 {offsets = [4, 0], sizes = [1, 64], strides = [1, 1]} : vector<9x64xf32> to vector<1x64xf32>
    %37 = vector.extract_strided_slice %31 {offsets = [5, 0], sizes = [1, 64], strides = [1, 1]} : vector<9x64xf32> to vector<1x64xf32>
    %38 = vector.extract_strided_slice %31 {offsets = [6, 0], sizes = [1, 64], strides = [1, 1]} : vector<9x64xf32> to vector<1x64xf32>
    %39 = vector.extract_strided_slice %31 {offsets = [7, 0], sizes = [1, 64], strides = [1, 1]} : vector<9x64xf32> to vector<1x64xf32>
    %40 = vector.extract_strided_slice %31 {offsets = [8, 0], sizes = [1, 64], strides = [1, 1]} : vector<9x64xf32> to vector<1x64xf32>
    %c0_17 = arith.constant 0 : index
    %c0_18 = arith.constant 0 : index
    %c0_19 = arith.constant 0 : index
    %c0_20 = arith.constant 0 : index
    %41 = vector.load %arg3[%c0_17, %c0_18, %c0_19, %c0_20] : memref<2x3x64x64xbf16, #tpu.memory_space<vmem>>, vector<1x3x64x64xbf16>
    %42 = vector.shape_cast %41 : vector<1x3x64x64xbf16> to vector<3x64x64xbf16>
    %c0_21 = arith.constant 0 : index
    %c0_22 = arith.constant 0 : index
    %c0_23 = arith.constant 0 : index
    %c0_24 = arith.constant 0 : index
    %43 = vector.load %arg6[%c0_21, %c0_22, %c0_23, %c0_24] : memref<2x4x16x64xbf16, #tpu.memory_space<vmem>>, vector<1x4x16x64xbf16>
    %44 = vector.shape_cast %43 : vector<1x4x16x64xbf16> to vector<4x16x64xbf16>
    %45 = arith.truncf %29 : vector<16x64xf32> to vector<16x64xbf16>
    %46 = vector.extract_strided_slice %42 {offsets = [0, 0, 0], sizes = [1, 64, 64], strides = [1, 1, 1]} : vector<3x64x64xbf16> to vector<1x64x64xbf16>
    %47 = vector.shape_cast %46 : vector<1x64x64xbf16> to vector<64x64xbf16>
    %cst_25 = arith.constant dense<0.000000e+00> : vector<16x64xf32>
    %48 = tpu.matmul %45, %47, %cst_25 {dimension_numbers = #tpu.dot_dimension_numbers<[1], [0], [0], [1], [0, 0, 1, 1], [], []>} : vector<16x64xbf16>, vector<64x64xbf16>, vector<16x64xf32> -> vector<16x64xf32>
    %49 = vector.broadcast %32 : vector<1x64xf32> to vector<16x64xf32>
    %50 = arith.addf %48, %49 : vector<16x64xf32>
    %51 = vector.shape_cast %50 : vector<16x64xf32> to vector<2x8x64xf32>
    %52 = arith.truncf %51 : vector<2x8x64xf32> to vector<2x8x64xbf16>
    %53 = vector.extract_strided_slice %42 {offsets = [1, 0, 0], sizes = [1, 64, 64], strides = [1, 1, 1]} : vector<3x64x64xbf16> to vector<1x64x64xbf16>
    %54 = vector.shape_cast %53 : vector<1x64x64xbf16> to vector<64x64xbf16>
    %cst_26 = arith.constant dense<0.000000e+00> : vector<16x64xf32>
    %55 = tpu.matmul %45, %54, %cst_26 {dimension_numbers = #tpu.dot_dimension_numbers<[1], [0], [0], [1], [0, 0, 1, 1], [], []>} : vector<16x64xbf16>, vector<64x64xbf16>, vector<16x64xf32> -> vector<16x64xf32>
    %56 = vector.broadcast %33 : vector<1x64xf32> to vector<16x64xf32>
    %57 = arith.addf %55, %56 : vector<16x64xf32>
    %58 = vector.shape_cast %57 : vector<16x64xf32> to vector<2x8x64xf32>
    %59 = arith.truncf %58 : vector<2x8x64xf32> to vector<2x8x64xbf16>
    %60 = vector.extract_strided_slice %42 {offsets = [2, 0, 0], sizes = [1, 64, 64], strides = [1, 1, 1]} : vector<3x64x64xbf16> to vector<1x64x64xbf16>
    %61 = vector.shape_cast %60 : vector<1x64x64xbf16> to vector<64x64xbf16>
    %cst_27 = arith.constant dense<0.000000e+00> : vector<16x64xf32>
    %62 = tpu.matmul %45, %61, %cst_27 {dimension_numbers = #tpu.dot_dimension_numbers<[1], [0], [0], [1], [0, 0, 1, 1], [], []>} : vector<16x64xbf16>, vector<64x64xbf16>, vector<16x64xf32> -> vector<16x64xf32>
    %63 = vector.broadcast %34 : vector<1x64xf32> to vector<16x64xf32>
    %64 = arith.addf %62, %63 : vector<16x64xf32>
    %65 = vector.shape_cast %64 : vector<16x64xf32> to vector<2x8x64xf32>
    %66 = arith.truncf %65 : vector<2x8x64xf32> to vector<2x8x64xbf16>
    %cst_28 = arith.constant 0.000000e+00 : f32
    %67 = vector.broadcast %cst_28 : f32 to vector<16x64xf32>
    %68 = vector.extract_strided_slice %52 {offsets = [0, 0, 0], sizes = [2, 8, 16], strides = [1, 1, 1]} : vector<2x8x64xbf16> to vector<2x8x16xbf16>
    %69 = vector.extract_strided_slice %59 {offsets = [0, 0, 0], sizes = [2, 8, 16], strides = [1, 1, 1]} : vector<2x8x64xbf16> to vector<2x8x16xbf16>
    "tpu.trace_start"() <{level = 10 : i32, message = "bqd,bkd->bqk"}> : () -> ()
    %cst_29 = arith.constant dense<0.000000e+00> : vector<2x8x8xf32>
    %70 = tpu.matmul %68, %69, %cst_29 {dimension_numbers = #tpu.dot_dimension_numbers<[2], [2], [1], [1], [0, 0, 0, 1, 1, 1], [0], [0]>} : vector<2x8x16xbf16>, vector<2x8x16xbf16>, vector<2x8x8xf32> -> vector<2x8x8xf32>
    "tpu.trace_stop"() : () -> ()
    %71 = vector.broadcast %0 : vector<2x1x8xf32> to vector<2x8x8xf32>
    %72 = arith.addf %70, %71 : vector<2x8x8xf32>
    %cst_30 = arith.constant dense<0xFF800000> : vector<2x8xf32>
    %73 = vector.multi_reduction <maximumf>, %72, %cst_30 [2] : vector<2x8x8xf32> to vector<2x8xf32>
    %74 = vector.shape_cast %73 : vector<2x8xf32> to vector<2x8x1xf32>
    %75 = vector.broadcast %74 : vector<2x8x1xf32> to vector<2x8x8xf32>
    %76 = arith.subf %72, %75 : vector<2x8x8xf32>
    %77 = math.exp %76 : vector<2x8x8xf32>
    %cst_31 = arith.constant dense<0.000000e+00> : vector<2x8xf32>
    %78 = vector.multi_reduction <add>, %77, %cst_31 [2] : vector<2x8x8xf32> to vector<2x8xf32>
    %79 = vector.shape_cast %78 : vector<2x8xf32> to vector<2x8x1xf32>
    %80 = tpu.reciprocal %79 {approx = true} : vector<2x8x1xf32> -> vector<2x8x1xf32>
    %81 = vector.broadcast %80 : vector<2x8x1xf32> to vector<2x8x8xf32>
    %82 = arith.mulf %77, %81 : vector<2x8x8xf32>
    %83 = arith.truncf %82 : vector<2x8x8xf32> to vector<2x8x8xbf16>
    %84 = vector.extract_strided_slice %66 {offsets = [0, 0, 0], sizes = [2, 8, 16], strides = [1, 1, 1]} : vector<2x8x64xbf16> to vector<2x8x16xbf16>
    "tpu.trace_start"() <{level = 10 : i32, message = "bqk,bkd->bqd"}> : () -> ()
    %cst_32 = arith.constant dense<0.000000e+00> : vector<2x8x16xf32>
    %85 = tpu.matmul %83, %84, %cst_32 {dimension_numbers = #tpu.dot_dimension_numbers<[2], [1], [1], [2], [0, 0, 0, 1, 1, 2], [0], [0]>} : vector<2x8x8xbf16>, vector<2x8x16xbf16>, vector<2x8x16xf32> -> vector<2x8x16xf32>
    "tpu.trace_stop"() : () -> ()
    %86 = vector.shape_cast %85 : vector<2x8x16xf32> to vector<16x16xf32>
    %87 = arith.truncf %86 : vector<16x16xf32> to vector<16x16xbf16>
    %88 = vector.extract_strided_slice %44 {offsets = [0, 0, 0], sizes = [1, 16, 64], strides = [1, 1, 1]} : vector<4x16x64xbf16> to vector<1x16x64xbf16>
    %89 = vector.shape_cast %88 : vector<1x16x64xbf16> to vector<16x64xbf16>
    %cst_33 = arith.constant dense<0.000000e+00> : vector<16x64xf32>
    %90 = tpu.matmul %87, %89, %cst_33 {dimension_numbers = #tpu.dot_dimension_numbers<[1], [0], [0], [1], [0, 0, 1, 1], [], []>} : vector<16x16xbf16>, vector<16x64xbf16>, vector<16x64xf32> -> vector<16x64xf32>
    %91 = arith.addf %67, %90 : vector<16x64xf32>
    %92 = vector.extract_strided_slice %52 {offsets = [0, 0, 16], sizes = [2, 8, 16], strides = [1, 1, 1]} : vector<2x8x64xbf16> to vector<2x8x16xbf16>
    %93 = vector.extract_strided_slice %59 {offsets = [0, 0, 16], sizes = [2, 8, 16], strides = [1, 1, 1]} : vector<2x8x64xbf16> to vector<2x8x16xbf16>
    "tpu.trace_start"() <{level = 10 : i32, message = "bqd,bkd->bqk"}> : () -> ()
    %cst_34 = arith.constant dense<0.000000e+00> : vector<2x8x8xf32>
    %94 = tpu.matmul %92, %93, %cst_34 {dimension_numbers = #tpu.dot_dimension_numbers<[2], [2], [1], [1], [0, 0, 0, 1, 1, 1], [0], [0]>} : vector<2x8x16xbf16>, vector<2x8x16xbf16>, vector<2x8x8xf32> -> vector<2x8x8xf32>
    "tpu.trace_stop"() : () -> ()
    %95 = vector.broadcast %0 : vector<2x1x8xf32> to vector<2x8x8xf32>
    %96 = arith.addf %94, %95 : vector<2x8x8xf32>
    %cst_35 = arith.constant dense<0xFF800000> : vector<2x8xf32>
    %97 = vector.multi_reduction <maximumf>, %96, %cst_35 [2] : vector<2x8x8xf32> to vector<2x8xf32>
    %98 = vector.shape_cast %97 : vector<2x8xf32> to vector<2x8x1xf32>
    %99 = vector.broadcast %98 : vector<2x8x1xf32> to vector<2x8x8xf32>
    %100 = arith.subf %96, %99 : vector<2x8x8xf32>
    %101 = math.exp %100 : vector<2x8x8xf32>
    %cst_36 = arith.constant dense<0.000000e+00> : vector<2x8xf32>
    %102 = vector.multi_reduction <add>, %101, %cst_36 [2] : vector<2x8x8xf32> to vector<2x8xf32>
    %103 = vector.shape_cast %102 : vector<2x8xf32> to vector<2x8x1xf32>
    %104 = tpu.reciprocal %103 {approx = true} : vector<2x8x1xf32> -> vector<2x8x1xf32>
    %105 = vector.broadcast %104 : vector<2x8x1xf32> to vector<2x8x8xf32>
    %106 = arith.mulf %101, %105 : vector<2x8x8xf32>
    %107 = arith.truncf %106 : vector<2x8x8xf32> to vector<2x8x8xbf16>
    %108 = vector.extract_strided_slice %66 {offsets = [0, 0, 16], sizes = [2, 8, 16], strides = [1, 1, 1]} : vector<2x8x64xbf16> to vector<2x8x16xbf16>
    "tpu.trace_start"() <{level = 10 : i32, message = "bqk,bkd->bqd"}> : () -> ()
    %cst_37 = arith.constant dense<0.000000e+00> : vector<2x8x16xf32>
    %109 = tpu.matmul %107, %108, %cst_37 {dimension_numbers = #tpu.dot_dimension_numbers<[2], [1], [1], [2], [0, 0, 0, 1, 1, 2], [0], [0]>} : vector<2x8x8xbf16>, vector<2x8x16xbf16>, vector<2x8x16xf32> -> vector<2x8x16xf32>
    "tpu.trace_stop"() : () -> ()
    %110 = vector.shape_cast %109 : vector<2x8x16xf32> to vector<16x16xf32>
    %111 = arith.truncf %110 : vector<16x16xf32> to vector<16x16xbf16>
    %112 = vector.extract_strided_slice %44 {offsets = [1, 0, 0], sizes = [1, 16, 64], strides = [1, 1, 1]} : vector<4x16x64xbf16> to vector<1x16x64xbf16>
    %113 = vector.shape_cast %112 : vector<1x16x64xbf16> to vector<16x64xbf16>
    %cst_38 = arith.constant dense<0.000000e+00> : vector<16x64xf32>
    %114 = tpu.matmul %111, %113, %cst_38 {dimension_numbers = #tpu.dot_dimension_numbers<[1], [0], [0], [1], [0, 0, 1, 1], [], []>} : vector<16x16xbf16>, vector<16x64xbf16>, vector<16x64xf32> -> vector<16x64xf32>
    %115 = arith.addf %91, %114 : vector<16x64xf32>
    %116 = vector.extract_strided_slice %52 {offsets = [0, 0, 32], sizes = [2, 8, 16], strides = [1, 1, 1]} : vector<2x8x64xbf16> to vector<2x8x16xbf16>
    %117 = vector.extract_strided_slice %59 {offsets = [0, 0, 32], sizes = [2, 8, 16], strides = [1, 1, 1]} : vector<2x8x64xbf16> to vector<2x8x16xbf16>
    "tpu.trace_start"() <{level = 10 : i32, message = "bqd,bkd->bqk"}> : () -> ()
    %cst_39 = arith.constant dense<0.000000e+00> : vector<2x8x8xf32>
    %118 = tpu.matmul %116, %117, %cst_39 {dimension_numbers = #tpu.dot_dimension_numbers<[2], [2], [1], [1], [0, 0, 0, 1, 1, 1], [0], [0]>} : vector<2x8x16xbf16>, vector<2x8x16xbf16>, vector<2x8x8xf32> -> vector<2x8x8xf32>
    "tpu.trace_stop"() : () -> ()
    %119 = vector.broadcast %0 : vector<2x1x8xf32> to vector<2x8x8xf32>
    %120 = arith.addf %118, %119 : vector<2x8x8xf32>
    %cst_40 = arith.constant dense<0xFF800000> : vector<2x8xf32>
    %121 = vector.multi_reduction <maximumf>, %120, %cst_40 [2] : vector<2x8x8xf32> to vector<2x8xf32>
    %122 = vector.shape_cast %121 : vector<2x8xf32> to vector<2x8x1xf32>
    %123 = vector.broadcast %122 : vector<2x8x1xf32> to vector<2x8x8xf32>
    %124 = arith.subf %120, %123 : vector<2x8x8xf32>
    %125 = math.exp %124 : vector<2x8x8xf32>
    %cst_41 = arith.constant dense<0.000000e+00> : vector<2x8xf32>
    %126 = vector.multi_reduction <add>, %125, %cst_41 [2] : vector<2x8x8xf32> to vector<2x8xf32>
    %127 = vector.shape_cast %126 : vector<2x8xf32> to vector<2x8x1xf32>
    %128 = tpu.reciprocal %127 {approx = true} : vector<2x8x1xf32> -> vector<2x8x1xf32>
    %129 = vector.broadcast %128 : vector<2x8x1xf32> to vector<2x8x8xf32>
    %130 = arith.mulf %125, %129 : vector<2x8x8xf32>
    %131 = arith.truncf %130 : vector<2x8x8xf32> to vector<2x8x8xbf16>
    %132 = vector.extract_strided_slice %66 {offsets = [0, 0, 32], sizes = [2, 8, 16], strides = [1, 1, 1]} : vector<2x8x64xbf16> to vector<2x8x16xbf16>
    "tpu.trace_start"() <{level = 10 : i32, message = "bqk,bkd->bqd"}> : () -> ()
    %cst_42 = arith.constant dense<0.000000e+00> : vector<2x8x16xf32>
    %133 = tpu.matmul %131, %132, %cst_42 {dimension_numbers = #tpu.dot_dimension_numbers<[2], [1], [1], [2], [0, 0, 0, 1, 1, 2], [0], [0]>} : vector<2x8x8xbf16>, vector<2x8x16xbf16>, vector<2x8x16xf32> -> vector<2x8x16xf32>
    "tpu.trace_stop"() : () -> ()
    %134 = vector.shape_cast %133 : vector<2x8x16xf32> to vector<16x16xf32>
    %135 = arith.truncf %134 : vector<16x16xf32> to vector<16x16xbf16>
    %136 = vector.extract_strided_slice %44 {offsets = [2, 0, 0], sizes = [1, 16, 64], strides = [1, 1, 1]} : vector<4x16x64xbf16> to vector<1x16x64xbf16>
    %137 = vector.shape_cast %136 : vector<1x16x64xbf16> to vector<16x64xbf16>
    %cst_43 = arith.constant dense<0.000000e+00> : vector<16x64xf32>
    %138 = tpu.matmul %135, %137, %cst_43 {dimension_numbers = #tpu.dot_dimension_numbers<[1], [0], [0], [1], [0, 0, 1, 1], [], []>} : vector<16x16xbf16>, vector<16x64xbf16>, vector<16x64xf32> -> vector<16x64xf32>
    %139 = arith.addf %115, %138 : vector<16x64xf32>
    %140 = vector.extract_strided_slice %52 {offsets = [0, 0, 48], sizes = [2, 8, 16], strides = [1, 1, 1]} : vector<2x8x64xbf16> to vector<2x8x16xbf16>
    %141 = vector.extract_strided_slice %59 {offsets = [0, 0, 48], sizes = [2, 8, 16], strides = [1, 1, 1]} : vector<2x8x64xbf16> to vector<2x8x16xbf16>
    "tpu.trace_start"() <{level = 10 : i32, message = "bqd,bkd->bqk"}> : () -> ()
    %cst_44 = arith.constant dense<0.000000e+00> : vector<2x8x8xf32>
    %142 = tpu.matmul %140, %141, %cst_44 {dimension_numbers = #tpu.dot_dimension_numbers<[2], [2], [1], [1], [0, 0, 0, 1, 1, 1], [0], [0]>} : vector<2x8x16xbf16>, vector<2x8x16xbf16>, vector<2x8x8xf32> -> vector<2x8x8xf32>
    "tpu.trace_stop"() : () -> ()
    %143 = vector.broadcast %0 : vector<2x1x8xf32> to vector<2x8x8xf32>
    %144 = arith.addf %142, %143 : vector<2x8x8xf32>
    %cst_45 = arith.constant dense<0xFF800000> : vector<2x8xf32>
    %145 = vector.multi_reduction <maximumf>, %144, %cst_45 [2] : vector<2x8x8xf32> to vector<2x8xf32>
    %146 = vector.shape_cast %145 : vector<2x8xf32> to vector<2x8x1xf32>
    %147 = vector.broadcast %146 : vector<2x8x1xf32> to vector<2x8x8xf32>
    %148 = arith.subf %144, %147 : vector<2x8x8xf32>
    %149 = math.exp %148 : vector<2x8x8xf32>
    %cst_46 = arith.constant dense<0.000000e+00> : vector<2x8xf32>
    %150 = vector.multi_reduction <add>, %149, %cst_46 [2] : vector<2x8x8xf32> to vector<2x8xf32>
    %151 = vector.shape_cast %150 : vector<2x8xf32> to vector<2x8x1xf32>
    %152 = tpu.reciprocal %151 {approx = true} : vector<2x8x1xf32> -> vector<2x8x1xf32>
    %153 = vector.broadcast %152 : vector<2x8x1xf32> to vector<2x8x8xf32>
    %154 = arith.mulf %149, %153 : vector<2x8x8xf32>
    %155 = arith.truncf %154 : vector<2x8x8xf32> to vector<2x8x8xbf16>
    %156 = vector.extract_strided_slice %66 {offsets = [0, 0, 48], sizes = [2, 8, 16], strides = [1, 1, 1]} : vector<2x8x64xbf16> to vector<2x8x16xbf16>
    "tpu.trace_start"() <{level = 10 : i32, message = "bqk,bkd->bqd"}> : () -> ()
    %cst_47 = arith.constant dense<0.000000e+00> : vector<2x8x16xf32>
    %157 = tpu.matmul %155, %156, %cst_47 {dimension_numbers = #tpu.dot_dimension_numbers<[2], [1], [1], [2], [0, 0, 0, 1, 1, 2], [0], [0]>} : vector<2x8x8xbf16>, vector<2x8x16xbf16>, vector<2x8x16xf32> -> vector<2x8x16xf32>
    "tpu.trace_stop"() : () -> ()
    %158 = vector.shape_cast %157 : vector<2x8x16xf32> to vector<16x16xf32>
    %159 = arith.truncf %158 : vector<16x16xf32> to vector<16x16xbf16>
    %160 = vector.extract_strided_slice %44 {offsets = [3, 0, 0], sizes = [1, 16, 64], strides = [1, 1, 1]} : vector<4x16x64xbf16> to vector<1x16x64xbf16>
    %161 = vector.shape_cast %160 : vector<1x16x64xbf16> to vector<16x64xbf16>
    %cst_48 = arith.constant dense<0.000000e+00> : vector<16x64xf32>
    %162 = tpu.matmul %159, %161, %cst_48 {dimension_numbers = #tpu.dot_dimension_numbers<[1], [0], [0], [1], [0, 0, 1, 1], [], []>} : vector<16x16xbf16>, vector<16x64xbf16>, vector<16x64xf32> -> vector<16x64xf32>
    %163 = arith.addf %139, %162 : vector<16x64xf32>
    %164 = arith.addf %29, %163 : vector<16x64xf32>
    %165 = vector.broadcast %35 : vector<1x64xf32> to vector<16x64xf32>
    %166 = arith.addf %164, %165 : vector<16x64xf32>
    %cst_49 = arith.constant dense<0.000000e+00> : vector<16xf32>
    %167 = vector.multi_reduction <add>, %166, %cst_49 [1] : vector<16x64xf32> to vector<16xf32>
    %168 = vector.shape_cast %167 : vector<16xf32> to vector<16x1xf32>
    %cst_50 = arith.constant 6.400000e+01 : f32
    %169 = vector.broadcast %cst_50 : f32 to vector<16x1xf32>
    %170 = arith.divf %168, %169 : vector<16x1xf32>
    %171 = arith.mulf %166, %166 : vector<16x64xf32>
    %cst_51 = arith.constant dense<0.000000e+00> : vector<16xf32>
    %172 = vector.multi_reduction <add>, %171, %cst_51 [1] : vector<16x64xf32> to vector<16xf32>
    %173 = vector.shape_cast %172 : vector<16xf32> to vector<16x1xf32>
    %cst_52 = arith.constant 6.400000e+01 : f32
    %174 = vector.broadcast %cst_52 : f32 to vector<16x1xf32>
    %175 = arith.divf %173, %174 : vector<16x1xf32>
    %176 = arith.mulf %170, %170 : vector<16x1xf32>
    %177 = arith.subf %175, %176 : vector<16x1xf32>
    %cst_53 = arith.constant 0.000000e+00 : f32
    %178 = vector.broadcast %cst_53 : f32 to vector<16x1xf32>
    %179 = arith.maximumf %177, %178 : vector<16x1xf32>
    %180 = vector.broadcast %170 : vector<16x1xf32> to vector<16x64xf32>
    %181 = arith.subf %166, %180 : vector<16x64xf32>
    %cst_54 = arith.constant 9.99999996E-13 : f32
    %182 = vector.broadcast %cst_54 : f32 to vector<16x1xf32>
    %183 = arith.addf %179, %182 : vector<16x1xf32>
    %184 = math.rsqrt %183 : vector<16x1xf32>
    %185 = vector.broadcast %184 : vector<16x1xf32> to vector<16x64xf32>
    %186 = arith.mulf %181, %185 : vector<16x64xf32>
    %187 = vector.broadcast %36 : vector<1x64xf32> to vector<16x64xf32>
    %188 = arith.mulf %186, %187 : vector<16x64xf32>
    %189 = vector.broadcast %37 : vector<1x64xf32> to vector<16x64xf32>
    %190 = arith.addf %188, %189 : vector<16x64xf32>
    %191 = arith.truncf %190 : vector<16x64xf32> to vector<16x64xbf16>
    %c0_55 = arith.constant 0 : index
    %c0_56 = arith.constant 0 : index
    %c0_57 = arith.constant 0 : index
    %192 = vector.load %arg7[%c0_55, %c0_56, %c0_57] : memref<2x64x128xbf16, #tpu.memory_space<vmem>>, vector<1x64x128xbf16>
    %193 = vector.shape_cast %192 : vector<1x64x128xbf16> to vector<64x128xbf16>
    %cst_58 = arith.constant dense<0.000000e+00> : vector<16x128xf32>
    %194 = tpu.matmul %191, %193, %cst_58 {dimension_numbers = #tpu.dot_dimension_numbers<[1], [0], [0], [1], [0, 0, 1, 1], [], []>} : vector<16x64xbf16>, vector<64x128xbf16>, vector<16x128xf32> -> vector<16x128xf32>
    %c0_59 = arith.constant 0 : index
    %c0_60 = arith.constant 0 : index
    %c0_61 = arith.constant 0 : index
    %195 = vector.load %arg5[%c0_59, %c0_60, %c0_61] : memref<2x1x128xf32, #tpu.memory_space<vmem>>, vector<1x1x128xf32>
    %196 = vector.shape_cast %195 : vector<1x1x128xf32> to vector<1x128xf32>
    %197 = vector.broadcast %196 : vector<1x128xf32> to vector<16x128xf32>
    %198 = arith.addf %194, %197 : vector<16x128xf32>
    %199 = arith.mulf %198, %198 : vector<16x128xf32>
    %200 = arith.mulf %198, %199 : vector<16x128xf32>
    %cst_62 = arith.constant 4.471500e-02 : f32
    %201 = vector.broadcast %cst_62 : f32 to vector<16x128xf32>
    %202 = arith.mulf %201, %200 : vector<16x128xf32>
    %203 = arith.addf %198, %202 : vector<16x128xf32>
    %cst_63 = arith.constant 0.797884583 : f32
    %204 = vector.broadcast %cst_63 : f32 to vector<16x128xf32>
    %205 = arith.mulf %204, %203 : vector<16x128xf32>
    %206 = math.tanh %205 : vector<16x128xf32>
    %cst_64 = arith.constant 1.000000e+00 : f32
    %207 = vector.broadcast %cst_64 : f32 to vector<16x128xf32>
    %208 = arith.addf %207, %206 : vector<16x128xf32>
    %cst_65 = arith.constant 5.000000e-01 : f32
    %209 = vector.broadcast %cst_65 : f32 to vector<16x128xf32>
    %210 = arith.mulf %209, %208 : vector<16x128xf32>
    %211 = arith.mulf %198, %210 : vector<16x128xf32>
    %212 = arith.truncf %211 : vector<16x128xf32> to vector<16x128xbf16>
    %c0_66 = arith.constant 0 : index
    %c0_67 = arith.constant 0 : index
    %c0_68 = arith.constant 0 : index
    %213 = vector.load %arg8[%c0_66, %c0_67, %c0_68] : memref<2x128x64xbf16, #tpu.memory_space<vmem>>, vector<1x128x64xbf16>
    %214 = vector.shape_cast %213 : vector<1x128x64xbf16> to vector<128x64xbf16>
    %cst_69 = arith.constant dense<0.000000e+00> : vector<16x64xf32>
    %215 = tpu.matmul %212, %214, %cst_69 {dimension_numbers = #tpu.dot_dimension_numbers<[1], [0], [0], [1], [0, 0, 1, 1], [], []>} : vector<16x128xbf16>, vector<128x64xbf16>, vector<16x64xf32> -> vector<16x64xf32>
    %216 = vector.broadcast %38 : vector<1x64xf32> to vector<16x64xf32>
    %217 = arith.addf %215, %216 : vector<16x64xf32>
    %218 = arith.addf %190, %217 : vector<16x64xf32>
    %cst_70 = arith.constant dense<0.000000e+00> : vector<16xf32>
    %219 = vector.multi_reduction <add>, %218, %cst_70 [1] : vector<16x64xf32> to vector<16xf32>
    %220 = vector.shape_cast %219 : vector<16xf32> to vector<16x1xf32>
    %cst_71 = arith.constant 6.400000e+01 : f32
    %221 = vector.broadcast %cst_71 : f32 to vector<16x1xf32>
    %222 = arith.divf %220, %221 : vector<16x1xf32>
    %223 = arith.mulf %218, %218 : vector<16x64xf32>
    %cst_72 = arith.constant dense<0.000000e+00> : vector<16xf32>
    %224 = vector.multi_reduction <add>, %223, %cst_72 [1] : vector<16x64xf32> to vector<16xf32>
    %225 = vector.shape_cast %224 : vector<16xf32> to vector<16x1xf32>
    %cst_73 = arith.constant 6.400000e+01 : f32
    %226 = vector.broadcast %cst_73 : f32 to vector<16x1xf32>
    %227 = arith.divf %225, %226 : vector<16x1xf32>
    %228 = arith.mulf %222, %222 : vector<16x1xf32>
    %229 = arith.subf %227, %228 : vector<16x1xf32>
    %cst_74 = arith.constant 0.000000e+00 : f32
    %230 = vector.broadcast %cst_74 : f32 to vector<16x1xf32>
    %231 = arith.maximumf %229, %230 : vector<16x1xf32>
    %232 = vector.broadcast %222 : vector<16x1xf32> to vector<16x64xf32>
    %233 = arith.subf %218, %232 : vector<16x64xf32>
    %cst_75 = arith.constant 9.99999996E-13 : f32
    %234 = vector.broadcast %cst_75 : f32 to vector<16x1xf32>
    %235 = arith.addf %231, %234 : vector<16x1xf32>
    %236 = math.rsqrt %235 : vector<16x1xf32>
    %237 = vector.broadcast %236 : vector<16x1xf32> to vector<16x64xf32>
    %238 = arith.mulf %233, %237 : vector<16x64xf32>
    %239 = vector.broadcast %39 : vector<1x64xf32> to vector<16x64xf32>
    %240 = arith.mulf %238, %239 : vector<16x64xf32>
    %241 = vector.broadcast %40 : vector<1x64xf32> to vector<16x64xf32>
    %242 = arith.addf %240, %241 : vector<16x64xf32>
    %c1_76 = arith.constant 1 : index
    %c0_77 = arith.constant 0 : index
    %c0_78 = arith.constant 0 : index
    %243 = vector.load %arg4[%c1_76, %c0_77, %c0_78] : memref<2x9x64xf32, #tpu.memory_space<vmem>>, vector<1x9x64xf32>
    %244 = vector.shape_cast %243 : vector<1x9x64xf32> to vector<9x64xf32>
    %245 = vector.extract_strided_slice %244 {offsets = [0, 0], sizes = [1, 64], strides = [1, 1]} : vector<9x64xf32> to vector<1x64xf32>
    %246 = vector.extract_strided_slice %244 {offsets = [1, 0], sizes = [1, 64], strides = [1, 1]} : vector<9x64xf32> to vector<1x64xf32>
    %247 = vector.extract_strided_slice %244 {offsets = [2, 0], sizes = [1, 64], strides = [1, 1]} : vector<9x64xf32> to vector<1x64xf32>
    %248 = vector.extract_strided_slice %244 {offsets = [3, 0], sizes = [1, 64], strides = [1, 1]} : vector<9x64xf32> to vector<1x64xf32>
    %249 = vector.extract_strided_slice %244 {offsets = [4, 0], sizes = [1, 64], strides = [1, 1]} : vector<9x64xf32> to vector<1x64xf32>
    %250 = vector.extract_strided_slice %244 {offsets = [5, 0], sizes = [1, 64], strides = [1, 1]} : vector<9x64xf32> to vector<1x64xf32>
    %251 = vector.extract_strided_slice %244 {offsets = [6, 0], sizes = [1, 64], strides = [1, 1]} : vector<9x64xf32> to vector<1x64xf32>
    %252 = vector.extract_strided_slice %244 {offsets = [7, 0], sizes = [1, 64], strides = [1, 1]} : vector<9x64xf32> to vector<1x64xf32>
    %253 = vector.extract_strided_slice %244 {offsets = [8, 0], sizes = [1, 64], strides = [1, 1]} : vector<9x64xf32> to vector<1x64xf32>
    %c1_79 = arith.constant 1 : index
    %c0_80 = arith.constant 0 : index
    %c0_81 = arith.constant 0 : index
    %c0_82 = arith.constant 0 : index
    %254 = vector.load %arg3[%c1_79, %c0_80, %c0_81, %c0_82] : memref<2x3x64x64xbf16, #tpu.memory_space<vmem>>, vector<1x3x64x64xbf16>
    %255 = vector.shape_cast %254 : vector<1x3x64x64xbf16> to vector<3x64x64xbf16>
    %c1_83 = arith.constant 1 : index
    %c0_84 = arith.constant 0 : index
    %c0_85 = arith.constant 0 : index
    %c0_86 = arith.constant 0 : index
    %256 = vector.load %arg6[%c1_83, %c0_84, %c0_85, %c0_86] : memref<2x4x16x64xbf16, #tpu.memory_space<vmem>>, vector<1x4x16x64xbf16>
    %257 = vector.shape_cast %256 : vector<1x4x16x64xbf16> to vector<4x16x64xbf16>
    %258 = arith.truncf %242 : vector<16x64xf32> to vector<16x64xbf16>
    %259 = vector.extract_strided_slice %255 {offsets = [0, 0, 0], sizes = [1, 64, 64], strides = [1, 1, 1]} : vector<3x64x64xbf16> to vector<1x64x64xbf16>
    %260 = vector.shape_cast %259 : vector<1x64x64xbf16> to vector<64x64xbf16>
    %cst_87 = arith.constant dense<0.000000e+00> : vector<16x64xf32>
    %261 = tpu.matmul %258, %260, %cst_87 {dimension_numbers = #tpu.dot_dimension_numbers<[1], [0], [0], [1], [0, 0, 1, 1], [], []>} : vector<16x64xbf16>, vector<64x64xbf16>, vector<16x64xf32> -> vector<16x64xf32>
    %262 = vector.broadcast %245 : vector<1x64xf32> to vector<16x64xf32>
    %263 = arith.addf %261, %262 : vector<16x64xf32>
    %264 = vector.shape_cast %263 : vector<16x64xf32> to vector<2x8x64xf32>
    %265 = arith.truncf %264 : vector<2x8x64xf32> to vector<2x8x64xbf16>
    %266 = vector.extract_strided_slice %255 {offsets = [1, 0, 0], sizes = [1, 64, 64], strides = [1, 1, 1]} : vector<3x64x64xbf16> to vector<1x64x64xbf16>
    %267 = vector.shape_cast %266 : vector<1x64x64xbf16> to vector<64x64xbf16>
    %cst_88 = arith.constant dense<0.000000e+00> : vector<16x64xf32>
    %268 = tpu.matmul %258, %267, %cst_88 {dimension_numbers = #tpu.dot_dimension_numbers<[1], [0], [0], [1], [0, 0, 1, 1], [], []>} : vector<16x64xbf16>, vector<64x64xbf16>, vector<16x64xf32> -> vector<16x64xf32>
    %269 = vector.broadcast %246 : vector<1x64xf32> to vector<16x64xf32>
    %270 = arith.addf %268, %269 : vector<16x64xf32>
    %271 = vector.shape_cast %270 : vector<16x64xf32> to vector<2x8x64xf32>
    %272 = arith.truncf %271 : vector<2x8x64xf32> to vector<2x8x64xbf16>
    %273 = vector.extract_strided_slice %255 {offsets = [2, 0, 0], sizes = [1, 64, 64], strides = [1, 1, 1]} : vector<3x64x64xbf16> to vector<1x64x64xbf16>
    %274 = vector.shape_cast %273 : vector<1x64x64xbf16> to vector<64x64xbf16>
    %cst_89 = arith.constant dense<0.000000e+00> : vector<16x64xf32>
    %275 = tpu.matmul %258, %274, %cst_89 {dimension_numbers = #tpu.dot_dimension_numbers<[1], [0], [0], [1], [0, 0, 1, 1], [], []>} : vector<16x64xbf16>, vector<64x64xbf16>, vector<16x64xf32> -> vector<16x64xf32>
    %276 = vector.broadcast %247 : vector<1x64xf32> to vector<16x64xf32>
    %277 = arith.addf %275, %276 : vector<16x64xf32>
    %278 = vector.shape_cast %277 : vector<16x64xf32> to vector<2x8x64xf32>
    %279 = arith.truncf %278 : vector<2x8x64xf32> to vector<2x8x64xbf16>
    %cst_90 = arith.constant 0.000000e+00 : f32
    %280 = vector.broadcast %cst_90 : f32 to vector<16x64xf32>
    %281 = vector.extract_strided_slice %265 {offsets = [0, 0, 0], sizes = [2, 8, 16], strides = [1, 1, 1]} : vector<2x8x64xbf16> to vector<2x8x16xbf16>
    %282 = vector.extract_strided_slice %272 {offsets = [0, 0, 0], sizes = [2, 8, 16], strides = [1, 1, 1]} : vector<2x8x64xbf16> to vector<2x8x16xbf16>
    "tpu.trace_start"() <{level = 10 : i32, message = "bqd,bkd->bqk"}> : () -> ()
    %cst_91 = arith.constant dense<0.000000e+00> : vector<2x8x8xf32>
    %283 = tpu.matmul %281, %282, %cst_91 {dimension_numbers = #tpu.dot_dimension_numbers<[2], [2], [1], [1], [0, 0, 0, 1, 1, 1], [0], [0]>} : vector<2x8x16xbf16>, vector<2x8x16xbf16>, vector<2x8x8xf32> -> vector<2x8x8xf32>
    "tpu.trace_stop"() : () -> ()
    %284 = vector.broadcast %0 : vector<2x1x8xf32> to vector<2x8x8xf32>
    %285 = arith.addf %283, %284 : vector<2x8x8xf32>
    %cst_92 = arith.constant dense<0xFF800000> : vector<2x8xf32>
    %286 = vector.multi_reduction <maximumf>, %285, %cst_92 [2] : vector<2x8x8xf32> to vector<2x8xf32>
    %287 = vector.shape_cast %286 : vector<2x8xf32> to vector<2x8x1xf32>
    %288 = vector.broadcast %287 : vector<2x8x1xf32> to vector<2x8x8xf32>
    %289 = arith.subf %285, %288 : vector<2x8x8xf32>
    %290 = math.exp %289 : vector<2x8x8xf32>
    %cst_93 = arith.constant dense<0.000000e+00> : vector<2x8xf32>
    %291 = vector.multi_reduction <add>, %290, %cst_93 [2] : vector<2x8x8xf32> to vector<2x8xf32>
    %292 = vector.shape_cast %291 : vector<2x8xf32> to vector<2x8x1xf32>
    %293 = tpu.reciprocal %292 {approx = true} : vector<2x8x1xf32> -> vector<2x8x1xf32>
    %294 = vector.broadcast %293 : vector<2x8x1xf32> to vector<2x8x8xf32>
    %295 = arith.mulf %290, %294 : vector<2x8x8xf32>
    %296 = arith.truncf %295 : vector<2x8x8xf32> to vector<2x8x8xbf16>
    %297 = vector.extract_strided_slice %279 {offsets = [0, 0, 0], sizes = [2, 8, 16], strides = [1, 1, 1]} : vector<2x8x64xbf16> to vector<2x8x16xbf16>
    "tpu.trace_start"() <{level = 10 : i32, message = "bqk,bkd->bqd"}> : () -> ()
    %cst_94 = arith.constant dense<0.000000e+00> : vector<2x8x16xf32>
    %298 = tpu.matmul %296, %297, %cst_94 {dimension_numbers = #tpu.dot_dimension_numbers<[2], [1], [1], [2], [0, 0, 0, 1, 1, 2], [0], [0]>} : vector<2x8x8xbf16>, vector<2x8x16xbf16>, vector<2x8x16xf32> -> vector<2x8x16xf32>
    "tpu.trace_stop"() : () -> ()
    %299 = vector.shape_cast %298 : vector<2x8x16xf32> to vector<16x16xf32>
    %300 = arith.truncf %299 : vector<16x16xf32> to vector<16x16xbf16>
    %301 = vector.extract_strided_slice %257 {offsets = [0, 0, 0], sizes = [1, 16, 64], strides = [1, 1, 1]} : vector<4x16x64xbf16> to vector<1x16x64xbf16>
    %302 = vector.shape_cast %301 : vector<1x16x64xbf16> to vector<16x64xbf16>
    %cst_95 = arith.constant dense<0.000000e+00> : vector<16x64xf32>
    %303 = tpu.matmul %300, %302, %cst_95 {dimension_numbers = #tpu.dot_dimension_numbers<[1], [0], [0], [1], [0, 0, 1, 1], [], []>} : vector<16x16xbf16>, vector<16x64xbf16>, vector<16x64xf32> -> vector<16x64xf32>
    %304 = arith.addf %280, %303 : vector<16x64xf32>
    %305 = vector.extract_strided_slice %265 {offsets = [0, 0, 16], sizes = [2, 8, 16], strides = [1, 1, 1]} : vector<2x8x64xbf16> to vector<2x8x16xbf16>
    %306 = vector.extract_strided_slice %272 {offsets = [0, 0, 16], sizes = [2, 8, 16], strides = [1, 1, 1]} : vector<2x8x64xbf16> to vector<2x8x16xbf16>
    "tpu.trace_start"() <{level = 10 : i32, message = "bqd,bkd->bqk"}> : () -> ()
    %cst_96 = arith.constant dense<0.000000e+00> : vector<2x8x8xf32>
    %307 = tpu.matmul %305, %306, %cst_96 {dimension_numbers = #tpu.dot_dimension_numbers<[2], [2], [1], [1], [0, 0, 0, 1, 1, 1], [0], [0]>} : vector<2x8x16xbf16>, vector<2x8x16xbf16>, vector<2x8x8xf32> -> vector<2x8x8xf32>
    "tpu.trace_stop"() : () -> ()
    %308 = vector.broadcast %0 : vector<2x1x8xf32> to vector<2x8x8xf32>
    %309 = arith.addf %307, %308 : vector<2x8x8xf32>
    %cst_97 = arith.constant dense<0xFF800000> : vector<2x8xf32>
    %310 = vector.multi_reduction <maximumf>, %309, %cst_97 [2] : vector<2x8x8xf32> to vector<2x8xf32>
    %311 = vector.shape_cast %310 : vector<2x8xf32> to vector<2x8x1xf32>
    %312 = vector.broadcast %311 : vector<2x8x1xf32> to vector<2x8x8xf32>
    %313 = arith.subf %309, %312 : vector<2x8x8xf32>
    %314 = math.exp %313 : vector<2x8x8xf32>
    %cst_98 = arith.constant dense<0.000000e+00> : vector<2x8xf32>
    %315 = vector.multi_reduction <add>, %314, %cst_98 [2] : vector<2x8x8xf32> to vector<2x8xf32>
    %316 = vector.shape_cast %315 : vector<2x8xf32> to vector<2x8x1xf32>
    %317 = tpu.reciprocal %316 {approx = true} : vector<2x8x1xf32> -> vector<2x8x1xf32>
    %318 = vector.broadcast %317 : vector<2x8x1xf32> to vector<2x8x8xf32>
    %319 = arith.mulf %314, %318 : vector<2x8x8xf32>
    %320 = arith.truncf %319 : vector<2x8x8xf32> to vector<2x8x8xbf16>
    %321 = vector.extract_strided_slice %279 {offsets = [0, 0, 16], sizes = [2, 8, 16], strides = [1, 1, 1]} : vector<2x8x64xbf16> to vector<2x8x16xbf16>
    "tpu.trace_start"() <{level = 10 : i32, message = "bqk,bkd->bqd"}> : () -> ()
    %cst_99 = arith.constant dense<0.000000e+00> : vector<2x8x16xf32>
    %322 = tpu.matmul %320, %321, %cst_99 {dimension_numbers = #tpu.dot_dimension_numbers<[2], [1], [1], [2], [0, 0, 0, 1, 1, 2], [0], [0]>} : vector<2x8x8xbf16>, vector<2x8x16xbf16>, vector<2x8x16xf32> -> vector<2x8x16xf32>
    "tpu.trace_stop"() : () -> ()
    %323 = vector.shape_cast %322 : vector<2x8x16xf32> to vector<16x16xf32>
    %324 = arith.truncf %323 : vector<16x16xf32> to vector<16x16xbf16>
    %325 = vector.extract_strided_slice %257 {offsets = [1, 0, 0], sizes = [1, 16, 64], strides = [1, 1, 1]} : vector<4x16x64xbf16> to vector<1x16x64xbf16>
    %326 = vector.shape_cast %325 : vector<1x16x64xbf16> to vector<16x64xbf16>
    %cst_100 = arith.constant dense<0.000000e+00> : vector<16x64xf32>
    %327 = tpu.matmul %324, %326, %cst_100 {dimension_numbers = #tpu.dot_dimension_numbers<[1], [0], [0], [1], [0, 0, 1, 1], [], []>} : vector<16x16xbf16>, vector<16x64xbf16>, vector<16x64xf32> -> vector<16x64xf32>
    %328 = arith.addf %304, %327 : vector<16x64xf32>
    %329 = vector.extract_strided_slice %265 {offsets = [0, 0, 32], sizes = [2, 8, 16], strides = [1, 1, 1]} : vector<2x8x64xbf16> to vector<2x8x16xbf16>
    %330 = vector.extract_strided_slice %272 {offsets = [0, 0, 32], sizes = [2, 8, 16], strides = [1, 1, 1]} : vector<2x8x64xbf16> to vector<2x8x16xbf16>
    "tpu.trace_start"() <{level = 10 : i32, message = "bqd,bkd->bqk"}> : () -> ()
    %cst_101 = arith.constant dense<0.000000e+00> : vector<2x8x8xf32>
    %331 = tpu.matmul %329, %330, %cst_101 {dimension_numbers = #tpu.dot_dimension_numbers<[2], [2], [1], [1], [0, 0, 0, 1, 1, 1], [0], [0]>} : vector<2x8x16xbf16>, vector<2x8x16xbf16>, vector<2x8x8xf32> -> vector<2x8x8xf32>
    "tpu.trace_stop"() : () -> ()
    %332 = vector.broadcast %0 : vector<2x1x8xf32> to vector<2x8x8xf32>
    %333 = arith.addf %331, %332 : vector<2x8x8xf32>
    %cst_102 = arith.constant dense<0xFF800000> : vector<2x8xf32>
    %334 = vector.multi_reduction <maximumf>, %333, %cst_102 [2] : vector<2x8x8xf32> to vector<2x8xf32>
    %335 = vector.shape_cast %334 : vector<2x8xf32> to vector<2x8x1xf32>
    %336 = vector.broadcast %335 : vector<2x8x1xf32> to vector<2x8x8xf32>
    %337 = arith.subf %333, %336 : vector<2x8x8xf32>
    %338 = math.exp %337 : vector<2x8x8xf32>
    %cst_103 = arith.constant dense<0.000000e+00> : vector<2x8xf32>
    %339 = vector.multi_reduction <add>, %338, %cst_103 [2] : vector<2x8x8xf32> to vector<2x8xf32>
    %340 = vector.shape_cast %339 : vector<2x8xf32> to vector<2x8x1xf32>
    %341 = tpu.reciprocal %340 {approx = true} : vector<2x8x1xf32> -> vector<2x8x1xf32>
    %342 = vector.broadcast %341 : vector<2x8x1xf32> to vector<2x8x8xf32>
    %343 = arith.mulf %338, %342 : vector<2x8x8xf32>
    %344 = arith.truncf %343 : vector<2x8x8xf32> to vector<2x8x8xbf16>
    %345 = vector.extract_strided_slice %279 {offsets = [0, 0, 32], sizes = [2, 8, 16], strides = [1, 1, 1]} : vector<2x8x64xbf16> to vector<2x8x16xbf16>
    "tpu.trace_start"() <{level = 10 : i32, message = "bqk,bkd->bqd"}> : () -> ()
    %cst_104 = arith.constant dense<0.000000e+00> : vector<2x8x16xf32>
    %346 = tpu.matmul %344, %345, %cst_104 {dimension_numbers = #tpu.dot_dimension_numbers<[2], [1], [1], [2], [0, 0, 0, 1, 1, 2], [0], [0]>} : vector<2x8x8xbf16>, vector<2x8x16xbf16>, vector<2x8x16xf32> -> vector<2x8x16xf32>
    "tpu.trace_stop"() : () -> ()
    %347 = vector.shape_cast %346 : vector<2x8x16xf32> to vector<16x16xf32>
    %348 = arith.truncf %347 : vector<16x16xf32> to vector<16x16xbf16>
    %349 = vector.extract_strided_slice %257 {offsets = [2, 0, 0], sizes = [1, 16, 64], strides = [1, 1, 1]} : vector<4x16x64xbf16> to vector<1x16x64xbf16>
    %350 = vector.shape_cast %349 : vector<1x16x64xbf16> to vector<16x64xbf16>
    %cst_105 = arith.constant dense<0.000000e+00> : vector<16x64xf32>
    %351 = tpu.matmul %348, %350, %cst_105 {dimension_numbers = #tpu.dot_dimension_numbers<[1], [0], [0], [1], [0, 0, 1, 1], [], []>} : vector<16x16xbf16>, vector<16x64xbf16>, vector<16x64xf32> -> vector<16x64xf32>
    %352 = arith.addf %328, %351 : vector<16x64xf32>
    %353 = vector.extract_strided_slice %265 {offsets = [0, 0, 48], sizes = [2, 8, 16], strides = [1, 1, 1]} : vector<2x8x64xbf16> to vector<2x8x16xbf16>
    %354 = vector.extract_strided_slice %272 {offsets = [0, 0, 48], sizes = [2, 8, 16], strides = [1, 1, 1]} : vector<2x8x64xbf16> to vector<2x8x16xbf16>
    "tpu.trace_start"() <{level = 10 : i32, message = "bqd,bkd->bqk"}> : () -> ()
    %cst_106 = arith.constant dense<0.000000e+00> : vector<2x8x8xf32>
    %355 = tpu.matmul %353, %354, %cst_106 {dimension_numbers = #tpu.dot_dimension_numbers<[2], [2], [1], [1], [0, 0, 0, 1, 1, 1], [0], [0]>} : vector<2x8x16xbf16>, vector<2x8x16xbf16>, vector<2x8x8xf32> -> vector<2x8x8xf32>
    "tpu.trace_stop"() : () -> ()
    %356 = vector.broadcast %0 : vector<2x1x8xf32> to vector<2x8x8xf32>
    %357 = arith.addf %355, %356 : vector<2x8x8xf32>
    %cst_107 = arith.constant dense<0xFF800000> : vector<2x8xf32>
    %358 = vector.multi_reduction <maximumf>, %357, %cst_107 [2] : vector<2x8x8xf32> to vector<2x8xf32>
    %359 = vector.shape_cast %358 : vector<2x8xf32> to vector<2x8x1xf32>
    %360 = vector.broadcast %359 : vector<2x8x1xf32> to vector<2x8x8xf32>
    %361 = arith.subf %357, %360 : vector<2x8x8xf32>
    %362 = math.exp %361 : vector<2x8x8xf32>
    %cst_108 = arith.constant dense<0.000000e+00> : vector<2x8xf32>
    %363 = vector.multi_reduction <add>, %362, %cst_108 [2] : vector<2x8x8xf32> to vector<2x8xf32>
    %364 = vector.shape_cast %363 : vector<2x8xf32> to vector<2x8x1xf32>
    %365 = tpu.reciprocal %364 {approx = true} : vector<2x8x1xf32> -> vector<2x8x1xf32>
    %366 = vector.broadcast %365 : vector<2x8x1xf32> to vector<2x8x8xf32>
    %367 = arith.mulf %362, %366 : vector<2x8x8xf32>
    %368 = arith.truncf %367 : vector<2x8x8xf32> to vector<2x8x8xbf16>
    %369 = vector.extract_strided_slice %279 {offsets = [0, 0, 48], sizes = [2, 8, 16], strides = [1, 1, 1]} : vector<2x8x64xbf16> to vector<2x8x16xbf16>
    "tpu.trace_start"() <{level = 10 : i32, message = "bqk,bkd->bqd"}> : () -> ()
    %cst_109 = arith.constant dense<0.000000e+00> : vector<2x8x16xf32>
    %370 = tpu.matmul %368, %369, %cst_109 {dimension_numbers = #tpu.dot_dimension_numbers<[2], [1], [1], [2], [0, 0, 0, 1, 1, 2], [0], [0]>} : vector<2x8x8xbf16>, vector<2x8x16xbf16>, vector<2x8x16xf32> -> vector<2x8x16xf32>
    "tpu.trace_stop"() : () -> ()
    %371 = vector.shape_cast %370 : vector<2x8x16xf32> to vector<16x16xf32>
    %372 = arith.truncf %371 : vector<16x16xf32> to vector<16x16xbf16>
    %373 = vector.extract_strided_slice %257 {offsets = [3, 0, 0], sizes = [1, 16, 64], strides = [1, 1, 1]} : vector<4x16x64xbf16> to vector<1x16x64xbf16>
    %374 = vector.shape_cast %373 : vector<1x16x64xbf16> to vector<16x64xbf16>
    %cst_110 = arith.constant dense<0.000000e+00> : vector<16x64xf32>
    %375 = tpu.matmul %372, %374, %cst_110 {dimension_numbers = #tpu.dot_dimension_numbers<[1], [0], [0], [1], [0, 0, 1, 1], [], []>} : vector<16x16xbf16>, vector<16x64xbf16>, vector<16x64xf32> -> vector<16x64xf32>
    %376 = arith.addf %352, %375 : vector<16x64xf32>
    %377 = arith.addf %242, %376 : vector<16x64xf32>
    %378 = vector.broadcast %248 : vector<1x64xf32> to vector<16x64xf32>
    %379 = arith.addf %377, %378 : vector<16x64xf32>
    %cst_111 = arith.constant dense<0.000000e+00> : vector<16xf32>
    %380 = vector.multi_reduction <add>, %379, %cst_111 [1] : vector<16x64xf32> to vector<16xf32>
    %381 = vector.shape_cast %380 : vector<16xf32> to vector<16x1xf32>
    %cst_112 = arith.constant 6.400000e+01 : f32
    %382 = vector.broadcast %cst_112 : f32 to vector<16x1xf32>
    %383 = arith.divf %381, %382 : vector<16x1xf32>
    %384 = arith.mulf %379, %379 : vector<16x64xf32>
    %cst_113 = arith.constant dense<0.000000e+00> : vector<16xf32>
    %385 = vector.multi_reduction <add>, %384, %cst_113 [1] : vector<16x64xf32> to vector<16xf32>
    %386 = vector.shape_cast %385 : vector<16xf32> to vector<16x1xf32>
    %cst_114 = arith.constant 6.400000e+01 : f32
    %387 = vector.broadcast %cst_114 : f32 to vector<16x1xf32>
    %388 = arith.divf %386, %387 : vector<16x1xf32>
    %389 = arith.mulf %383, %383 : vector<16x1xf32>
    %390 = arith.subf %388, %389 : vector<16x1xf32>
    %cst_115 = arith.constant 0.000000e+00 : f32
    %391 = vector.broadcast %cst_115 : f32 to vector<16x1xf32>
    %392 = arith.maximumf %390, %391 : vector<16x1xf32>
    %393 = vector.broadcast %383 : vector<16x1xf32> to vector<16x64xf32>
    %394 = arith.subf %379, %393 : vector<16x64xf32>
    %cst_116 = arith.constant 9.99999996E-13 : f32
    %395 = vector.broadcast %cst_116 : f32 to vector<16x1xf32>
    %396 = arith.addf %392, %395 : vector<16x1xf32>
    %397 = math.rsqrt %396 : vector<16x1xf32>
    %398 = vector.broadcast %397 : vector<16x1xf32> to vector<16x64xf32>
    %399 = arith.mulf %394, %398 : vector<16x64xf32>
    %400 = vector.broadcast %249 : vector<1x64xf32> to vector<16x64xf32>
    %401 = arith.mulf %399, %400 : vector<16x64xf32>
    %402 = vector.broadcast %250 : vector<1x64xf32> to vector<16x64xf32>
    %403 = arith.addf %401, %402 : vector<16x64xf32>
    %404 = arith.truncf %403 : vector<16x64xf32> to vector<16x64xbf16>
    %c1_117 = arith.constant 1 : index
    %c0_118 = arith.constant 0 : index
    %c0_119 = arith.constant 0 : index
    %405 = vector.load %arg7[%c1_117, %c0_118, %c0_119] : memref<2x64x128xbf16, #tpu.memory_space<vmem>>, vector<1x64x128xbf16>
    %406 = vector.shape_cast %405 : vector<1x64x128xbf16> to vector<64x128xbf16>
    %cst_120 = arith.constant dense<0.000000e+00> : vector<16x128xf32>
    %407 = tpu.matmul %404, %406, %cst_120 {dimension_numbers = #tpu.dot_dimension_numbers<[1], [0], [0], [1], [0, 0, 1, 1], [], []>} : vector<16x64xbf16>, vector<64x128xbf16>, vector<16x128xf32> -> vector<16x128xf32>
    %c1_121 = arith.constant 1 : index
    %c0_122 = arith.constant 0 : index
    %c0_123 = arith.constant 0 : index
    %408 = vector.load %arg5[%c1_121, %c0_122, %c0_123] : memref<2x1x128xf32, #tpu.memory_space<vmem>>, vector<1x1x128xf32>
    %409 = vector.shape_cast %408 : vector<1x1x128xf32> to vector<1x128xf32>
    %410 = vector.broadcast %409 : vector<1x128xf32> to vector<16x128xf32>
    %411 = arith.addf %407, %410 : vector<16x128xf32>
    %412 = arith.mulf %411, %411 : vector<16x128xf32>
    %413 = arith.mulf %411, %412 : vector<16x128xf32>
    %cst_124 = arith.constant 4.471500e-02 : f32
    %414 = vector.broadcast %cst_124 : f32 to vector<16x128xf32>
    %415 = arith.mulf %414, %413 : vector<16x128xf32>
    %416 = arith.addf %411, %415 : vector<16x128xf32>
    %cst_125 = arith.constant 0.797884583 : f32
    %417 = vector.broadcast %cst_125 : f32 to vector<16x128xf32>
    %418 = arith.mulf %417, %416 : vector<16x128xf32>
    %419 = math.tanh %418 : vector<16x128xf32>
    %cst_126 = arith.constant 1.000000e+00 : f32
    %420 = vector.broadcast %cst_126 : f32 to vector<16x128xf32>
    %421 = arith.addf %420, %419 : vector<16x128xf32>
    %cst_127 = arith.constant 5.000000e-01 : f32
    %422 = vector.broadcast %cst_127 : f32 to vector<16x128xf32>
    %423 = arith.mulf %422, %421 : vector<16x128xf32>
    %424 = arith.mulf %411, %423 : vector<16x128xf32>
    %425 = arith.truncf %424 : vector<16x128xf32> to vector<16x128xbf16>
    %c1_128 = arith.constant 1 : index
    %c0_129 = arith.constant 0 : index
    %c0_130 = arith.constant 0 : index
    %426 = vector.load %arg8[%c1_128, %c0_129, %c0_130] : memref<2x128x64xbf16, #tpu.memory_space<vmem>>, vector<1x128x64xbf16>
    %427 = vector.shape_cast %426 : vector<1x128x64xbf16> to vector<128x64xbf16>
    %cst_131 = arith.constant dense<0.000000e+00> : vector<16x64xf32>
    %428 = tpu.matmul %425, %427, %cst_131 {dimension_numbers = #tpu.dot_dimension_numbers<[1], [0], [0], [1], [0, 0, 1, 1], [], []>} : vector<16x128xbf16>, vector<128x64xbf16>, vector<16x64xf32> -> vector<16x64xf32>
    %429 = vector.broadcast %251 : vector<1x64xf32> to vector<16x64xf32>
    %430 = arith.addf %428, %429 : vector<16x64xf32>
    %431 = arith.addf %403, %430 : vector<16x64xf32>
    %cst_132 = arith.constant dense<0.000000e+00> : vector<16xf32>
    %432 = vector.multi_reduction <add>, %431, %cst_132 [1] : vector<16x64xf32> to vector<16xf32>
    %433 = vector.shape_cast %432 : vector<16xf32> to vector<16x1xf32>
    %cst_133 = arith.constant 6.400000e+01 : f32
    %434 = vector.broadcast %cst_133 : f32 to vector<16x1xf32>
    %435 = arith.divf %433, %434 : vector<16x1xf32>
    %436 = arith.mulf %431, %431 : vector<16x64xf32>
    %cst_134 = arith.constant dense<0.000000e+00> : vector<16xf32>
    %437 = vector.multi_reduction <add>, %436, %cst_134 [1] : vector<16x64xf32> to vector<16xf32>
    %438 = vector.shape_cast %437 : vector<16xf32> to vector<16x1xf32>
    %cst_135 = arith.constant 6.400000e+01 : f32
    %439 = vector.broadcast %cst_135 : f32 to vector<16x1xf32>
    %440 = arith.divf %438, %439 : vector<16x1xf32>
    %441 = arith.mulf %435, %435 : vector<16x1xf32>
    %442 = arith.subf %440, %441 : vector<16x1xf32>
    %cst_136 = arith.constant 0.000000e+00 : f32
    %443 = vector.broadcast %cst_136 : f32 to vector<16x1xf32>
    %444 = arith.maximumf %442, %443 : vector<16x1xf32>
    %445 = vector.broadcast %435 : vector<16x1xf32> to vector<16x64xf32>
    %446 = arith.subf %431, %445 : vector<16x64xf32>
    %cst_137 = arith.constant 9.99999996E-13 : f32
    %447 = vector.broadcast %cst_137 : f32 to vector<16x1xf32>
    %448 = arith.addf %444, %447 : vector<16x1xf32>
    %449 = math.rsqrt %448 : vector<16x1xf32>
    %450 = vector.broadcast %449 : vector<16x1xf32> to vector<16x64xf32>
    %451 = arith.mulf %446, %450 : vector<16x64xf32>
    %452 = vector.broadcast %252 : vector<1x64xf32> to vector<16x64xf32>
    %453 = arith.mulf %451, %452 : vector<16x64xf32>
    %454 = vector.broadcast %253 : vector<1x64xf32> to vector<16x64xf32>
    %455 = arith.addf %453, %454 : vector<16x64xf32>
    %456 = vector.shape_cast %455 : vector<16x64xf32> to vector<2x8x64xf32>
    %457 = vector.extract_strided_slice %456 {offsets = [0, 0, 0], sizes = [2, 1, 64], strides = [1, 1, 1]} : vector<2x8x64xf32> to vector<2x1x64xf32>
    %458 = vector.shape_cast %457 : vector<2x1x64xf32> to vector<2x64xf32>
    %c0_138 = arith.constant 0 : index
    %c0_139 = arith.constant 0 : index
    %459 = vector.load %arg9[%c0_138, %c0_139] : memref<2x64xf32, #tpu.memory_space<vmem>>, vector<2x64xf32>
    tpu.vector_store %arg9[%c0_138, %c0_139], %458 {strides = array<i32>} : memref<2x64xf32, #tpu.memory_space<vmem>>, vector<2x64xf32>,
    return
  }
}

</mosaic_0001>

<bundles_post_ra>
// kernel: text_encoder_forward.1
= control target key start
LH: loop header
LB: loop body
LE: loop exit
PB: predicated region body
PF: predicated region fallthrough
CT: control target
= control target key end

     0   :  { %vm41_vm0 = vcmask 523264   ;;  %v4286_v10 = vmov 0.0   ;;  %vm4287_vm1 = vmmov 0   ;;  %s5155_s0 = inlined_call_operand.vmem [shape: f32[16,64], index: 0, kind: input, shape index: {}]   ;;  %s5156_s1 = inlined_call_operand.vmem [shape: f32[2,1,8], index: 1, kind: input, shape index: {}]   ;;  %s5157_s2 = inlined_call_operand.vmem [shape: f32[2,1,64], index: 2, kind: input, shape index: {}]   ;;  %s5158_s3 = inlined_call_operand.vmem [shape: bf16[2,3,64,64], index: 3, kind: input, shape index: {}]   ;;  %s5159_s4 = inlined_call_operand.vmem [shape: f32[2,9,64], index: 4, kind: input, shape index: {}]   ;;  %s5160_s5 = inlined_call_operand.vmem [shape: f32[2,1,128], index: 5, kind: input, shape index: {}]   ;;  %s5161_s6 = inlined_call_operand.vmem [shape: bf16[2,4,16,64], index: 6, kind: input, shape index: {}]   ;;  %s5162_s7 = inlined_call_operand.vmem [shape: bf16[2,64,128], index: 7, kind: input, shape index: {}]   ;;  %s5163_s8 = inlined_call_operand.vmem [shape: bf16[2,128,64], index: 8, kind: input, shape index: {}]   ;;  %s5164_s9 = inlined_call_operand.hbm [shape: f32[2,64], index: 9, kind: output, shape index: {}]  }
   0x1   :  { %v4345_v0 = vld [vmem:[%s5155_s0] sm:$0xff]  ;;  %v4350_v1 = vld [vmem:[%s5155_s0 + $0x8] sm:$0xff]  ;;  %v4112_v8 = vld [vmem:[%s5158_s3 + $0x18] sm:$0xff]   ;;  %3730 = vmatprep.subr.bf16.mxu0 %v4286_v10  ;;  %3742 = vmatprep.subr.bf16.mxu1 %v4286_v10 }
   0x2   :  { %v42_v2 = vsel %vm41_vm0, %v4345_v0, 0.0  ;;  %v51_v3 = vmul.f32 %v4345_v0, %v4345_v0  ;;  %v45_v4 = vsel %vm41_vm0, %v4350_v1, 0.0  ;;  %v52_v5 = vmul.f32 %v4350_v1, %v4350_v1  ;;  %v4113_v9 = vld [vmem:[%s5158_s3 + $0x38] sm:$0xff]   ;;  %3731 = vmatpush3.bf16.msra.mxu0 %v4112_v8  ;;  %v4114_v11 = vld [vmem:[%s5158_s3 + $0x10] sm:$0xff]   ;;  %v4116_v13 = vld [vmem:[%s5158_s3 + $0x8] sm:$0xff]   ;;  %3738 = vmatprep.mubr.msk.bf16.mxu0 %vm4287_vm1, %v4286_v10 }
   0x3   :  { %43 = vadd.xlane.f32.xlu0 %v42_v2  ;;  %3743 = vmatpush3.bf16.msra.mxu1 %v4113_v9  ;;  %v4115_v12 = vld [vmem:[%s5158_s3 + $0x30] sm:$0xff]   ;;  %v4117_v14 = vld [vmem:[%s5158_s3 + $0x28] sm:$0xff]   ;;  %v4118_v15 = vld [vmem:[%s5158_s3] sm:$0xff]  }
   0x4   :  { %v53_v6 = vsel %vm41_vm0, %v51_v3, 0.0  ;;  %v56_v7 = vsel %vm41_vm0, %v52_v5, 0.0  ;;  %3732 = vmatprep.subr.bf16.mxu0 %v4286_v10  ;;  %3744 = vmatprep.subr.bf16.mxu1 %v4286_v10  ;;  %v4119_v16 = vld [vmem:[%s5158_s3 + $0x20] sm:$0xff]  }
   0x5   :  { %54 = vadd.xlane.f32.xlu1 %v53_v6  ;;  %3750 = vmatprep.mubr.msk.bf16.mxu1 %vm4287_vm1, %v4286_v10 }
   0x6   :  { %3733 = vmatpush3.bf16.msra.mxu0 %v4114_v11 }
   0x7   :  { %46 = vadd.xlane.f32.xlu0 %v45_v4  ;;  %3745 = vmatpush3.bf16.msra.mxu1 %v4115_v12 }
   0x8   :  { %3734 = vmatprep.subr.bf16.mxu0 %v4286_v10  ;;  %3746 = vmatprep.subr.bf16.mxu1 %v4286_v10 }
   0x9   :  { %57 = vadd.xlane.f32.xlu1 %v56_v7 }
   0xa   :  { %3735 = vmatpush3.bf16.msra.mxu0 %v4116_v13 }
   0xb   :  { %3747 = vmatpush3.bf16.msra.mxu1 %v4117_v14  ;;  %3736 = vmatprep.subr.bf16.mxu0 %v4286_v10 }
   0xc   :  { %3748 = vmatprep.subr.bf16.mxu1 %v4286_v10 }
   0xe   :  { %3737 = vmatpush3.bf16.msra.mxu0 %v4118_v15 }
   0xf   :  { %3749 = vmatpush3.bf16.msra.mxu1 %v4119_v16  ;;  %3754 = vmatprep.subr.bf16.mxu0 %v4286_v10 }
  0x10   :  { %3772 = vmatprep.subr.bf16.mxu1 %v4286_v10 }
  0x11   :  { %14 = vsyncpa [#allocation3], 0  ;;  %v3421_v36 = vld [vmem:[%s5157_s2] ss:$0 sm:$0xff]  ;;  %v3422_v41 = vld [vmem:[%s5157_s2 + $0x1] ss:$0 sm:$0xff]  ;;  %v126_v50 = vlaneseq }
  0x12   :  { %v4120_v45 = vld [vmem:[%s5158_s3 + $0x58] sm:$0xff]   ;;  %v4121_v47 = vld [vmem:[%s5158_s3 + $0x50] sm:$0xff]   ;;  %v4122_v48 = vld [vmem:[%s5158_s3 + $0x48] sm:$0xff]   ;;  %vm354_vm2 = vcmask 130048   ;;  %vm475_vm3 = vcmask 1043456   ;;  %vm447_vm4 = vcmask 64512  }
  0x13   :  { %v4123_v49 = vld [vmem:[%s5158_s3 + $0x40] sm:$0xff]   ;;  %v4439_v51 = vshrl.u32 %v126_v50, 7  ;;  %s4288_s23 = smov 112   ;;  %s4289_s24 = smov 96   ;;  %vm3401_vm5 = vcmask 1041409   ;;  %vm3404_vm6 = vcmask 517120  }
  0x14   :  { %v4445_v53 = vld [vmem:[%s5159_s4] sm:$0xff]  ;;  %s4290_s29 = smov 80   ;;  %s4291_s14 = smov [#allocation2]  }
  0x15   :  { %v202_v52 = vsub.s32 1, %v4439_v51  ;;  %v128_v55 = vsub.s32 0, %v4439_v51  ;;  %v273_v8 = vsub.s32 2, %v4439_v51  ;;  %s3412_s15 = sshll.u32 %s4291_s14, 4  ;;  %s3413_s15 = int_to_ptr.vmem [resolvable:$true] %s3412_s15 }
  0x16   :  { %s4264_s16 = scalar_lea.vmem %s3413_s15, 32  ;;  %p4269_p1 = scmp.lt.s32.totalorder %s3413_s15, %s3413_s15 }
  0x17   :  { %v203_v54 = vrot.slane %v4445_v53, %v202_v52  ;;  %v129_v61 = vrot.slane %v4445_v53, %v128_v55  ;;  %v274_v12 = vrot.slane %v4445_v53, %v273_v8  ;;  %p4265_p0 = scmp.ne.s32.totalorder %s3413_s15, %s4264_s16  ;;  %p4270_p2 = scmp.lt.s32.totalorder %s4264_s16, %s4264_s16 }
  0x19   :  { %p4271_p3 = por %p4270_p2, %p4269_p1 }
  0x1b   :  { %p4272_p4 = pnand %p4271_p3, %p4265_p0 }
  0x8c   :  { %v44_v17 = vpop.xlane.xlu0 %43 }
  0x8d   :  { %v49_v18 = vmul.f32 0.015625, %v44_v17 }
  0x8e   :  { %v55_v19 = vpop.xlane.xlu1 %54 }
  0x8f   :  { %v61_v20 = vmul.f32 %v49_v18, %v49_v18  ;;  %v59_v21 = vmul.f32 0.015625, %v55_v19  ;;  %v67_v33 = vsub.f32 %v4345_v0, %v49_v18 }
  0x90   :  { %v47_v22 = vpop.xlane.xlu0 %46 }
  0x91   :  { %v63_v23 = vsub.f32 %v59_v21, %v61_v20  ;;  %v50_v24 = vmul.f32 0.015625, %v47_v22 }
  0x92   :  { %v58_v25 = vpop.xlane.xlu1 %57 }
  0x93   :  { %v65_v26 = vmax.f32 %v63_v23, 0.0  ;;  %v62_v27 = vmul.f32 %v50_v24, %v50_v24  ;;  %v60_v28 = vmul.f32 0.015625, %v58_v25  ;;  %v68_v37 = vsub.f32 %v4350_v1, %v50_v24  ;;  %v4493_v24 = vld [vmem:[%s5156_s1] ss:$0 sm:$0xff] }
  0x95   :  { %v69_v29 = vadd.f32 1e-12, %v65_v26  ;;  %v64_v30 = vsub.f32 %v60_v28, %v62_v27  ;;  %v4499_v28 = vld [vmem:[%s5156_s1 + $0x1] ss:$0 sm:$0xff] }
  0x97   :  { %4168 = vrsqrt.f32 %v69_v29  ;;  %v66_v31 = vmax.f32 %v64_v30, 0.0 }
  0x99   :  { %v70_v32 = vadd.f32 1e-12, %v66_v31 }
  0x9b   :  { %4170 = vrsqrt.f32 %v70_v32 }
  0xa4   :  { %v4169_v34 = vpop.eup %4168 }
  0xa5   :  { %v73_v35 = vmul.f32 %v4169_v34, %v67_v33 }
  0xa7   :  { %v81_v40 = vmul.f32 %v3421_v36, %v73_v35 }
  0xa8   :  { %v4171_v38 = vpop.eup %4170 }
  0xa9   :  { %v74_v39 = vmul.f32 %v4171_v38, %v68_v37  ;;  %v4408_v43 = vadd.f32 %v3422_v41, %v81_v40 }
  0xab   :  { %v82_v42 = vmul.f32 %v3421_v36, %v74_v39 }
  0xad   :  { %v4410_v44 = vadd.f32 %v3422_v41, %v82_v42 }
  0xaf   :  { %v125_v46 = vpack.c.bf16 %v4410_v44, %v4408_v43 }
  0xb1   :  { %3739 = vmatmul.mubr.msk.bf16.vlgmr.msra.gmra.mxu0 %vm41_vm0, %v125_v46  ;;  %3751 = vmatmul.mubr.msk.bf16.vlgmr.msra.gmra.mxu1 %vm41_vm0, %v125_v46 }
  0xb2   :  { %3755 = vmatpush3.bf16.msra.mxu0 %v4120_v45  ;;  %3762 = vmatprep.mubr.msk.bf16.mxu0 %vm4287_vm1, %v4286_v10 }
  0xb3   :  { %3756 = vmatprep.subr.bf16.mxu0 %v4286_v10  ;;  %3774 = vmatprep.mubr.msk.bf16.mxu1 %vm4287_vm1, %v4286_v10 }
  0xb6   :  { %3757 = vmatpush3.bf16.msra.mxu0 %v4121_v47 }
  0xb7   :  { %3758 = vmatprep.subr.bf16.mxu0 %v4286_v10 }
  0xba   :  { %3759 = vmatpush3.bf16.msra.mxu0 %v4122_v48 }
  0xbb   :  { %3760 = vmatprep.subr.bf16.mxu0 %v4286_v10 }
  0xbe   :  { %3761 = vmatpush3.bf16.msra.mxu0 %v4123_v49 }
  0xbf   :  { %3766 = vmatprep.subr.bf16.mxu0 %v4286_v10 }
  0xc1   :  { %3763 = vmatmul.mubr.msk.bf16.vlgmr.msra.gmra.mxu0 %vm41_vm0, %v125_v46 }
  0xc2   :  { %3768 = vmatprep.mubr.msk.bf16.mxu0 %vm4287_vm1, %v4286_v10 }
 0x171   :  { %v191_v56 = vpop.f32.mrf.mxu0  ;;  %v262_v57 = vpop.f32.mrf.mxu1 }
 0x172   :  { %v263_v58 = vadd.f32 %v262_v57, %v203_v54  ;;  %v192_v5 = vadd.f32 %v191_v56, %v129_v61 }
 0x173   :  { %v3740_v59 = vpop.f32.mrf.mxu0  ;;  %v3752_v60 = vpop.f32.mrf.mxu1 }
 0x174   :  { %v4454_v62 = vpack.c.bf16 %v263_v58, %v263_v58  ;;  %v4464_v9 = vpack.c.bf16 %v192_v5, %v192_v5 }
 0x175   :  { %v194_v63 = vpop.f32.mrf.mxu0  ;;  %v265_v0 = vpop.f32.mrf.mxu1 }
 0x176   :  { %v266_v1 = vadd.f32 %v265_v0, %v203_v54  ;;  %v359_v2 = vsel %vm354_vm2, %v4454_v62, 0  ;;  %v195_v11 = vadd.f32 %v194_v63, %v129_v61 }
 0x177   :  { %v3741_v3 = vpop.f32.mrf.mxu0  ;;  %v3753_v4 = vpop.f32.mrf.mxu1  ;;  %3767 = vmatpush3.bf16.xpose.msra.mxu0 %v359_v2 }
 0x178   :  { %v4458_v6 = vpack.c.bf16 %v266_v1, %v266_v1  ;;  %3778 = vmatprep.subr.bf16.mxu0 %v4286_v10  ;;  %v4474_v13 = vpack.c.bf16 %v195_v11, %v195_v11 }
 0x17a   :  { %v405_v7 = vsel %vm354_vm2, %v4458_v6, 0 }
 0x17b   :  { %3773 = vmatpush3.bf16.xpose.msra.mxu1 %v405_v7 }
 0x17c   :  { %3784 = vmatprep.subr.bf16.mxu1 %v4286_v10 }
 0x17e   :  { %3769 = vmatmul.mubr.msk.bf16.vlgmr.msra.gmra.mxu0 %vm354_vm2, %v4464_v9 }
 0x17f   :  { %3780 = vmatprep.mubr.msk.bf16.mxu0 %vm4287_vm1, %v4286_v10 }
 0x181   :  { %v333_v14 = vpop.f32.mrf.mxu0 }
 0x182   :  { %v334_v15 = vadd.f32 %v333_v14, %v274_v12  ;;  %3775 = vmatmul.mubr.msk.bf16.vlgmr.msra.gmra.mxu1 %vm354_vm2, %v4474_v13 }
 0x183   :  { %v3764_v16 = vpop.f32.mrf.mxu0  ;;  %3786 = vmatprep.mubr.msk.bf16.mxu1 %vm4287_vm1, %v4286_v10 }
 0x184   :  { %v4480_v17 = vpack.c.bf16 %v334_v15, %v334_v15 }
 0x185   :  { %v336_v18 = vpop.f32.mrf.mxu0 }
 0x186   :  { %v337_v19 = vadd.f32 %v336_v18, %v274_v12  ;;  %v477_v20 = vsel %vm475_vm3, %v4480_v17, 0 }
 0x187   :  { %v3765_v21 = vpop.f32.mrf.mxu0  ;;  %3779 = vmatpush3.bf16.msra.mxu0 %v477_v20 }
 0x188   :  { %v4484_v22 = vpack.c.bf16 %v337_v19, %v337_v19  ;;  %3790 = vmatprep.subr.bf16.mxu0 %v4286_v10 }
 0x18a   :  { %v523_v23 = vsel %vm475_vm3, %v4484_v22, 0 }
 0x18b   :  { %3785 = vmatpush3.bf16.msra.mxu1 %v523_v23 }
 0x18c   :  { %3796 = vmatprep.subr.bf16.mxu1 %v4286_v10 }
 0x23e   :  { %v395_v25 = vpop.f32.mrf.mxu0 }
 0x23f   :  { %v396_v26 = vadd.f32 %v4493_v24, %v395_v25 }
 0x240   :  { %v3770_v27 = vpop.f32.mrf.mxu0 }
 0x241   :  { %v448_v29 = vsel %vm447_vm4, %v396_v26, -inf }
 0x242   :  { %v398_v30 = vpop.f32.mrf.mxu0  ;;  %v441_v31 = vpop.f32.mrf.mxu1  ;;  %449 = vmax.xlane.f32.xlu0 %v448_v29 }
 0x243   :  { %v442_v32 = vadd.f32 %v4499_v28, %v441_v31 }
 0x244   :  { %v3771_v33 = vpop.f32.mrf.mxu0  ;;  %v3776_v34 = vpop.f32.mrf.mxu1 }
 0x245   :  { %v451_v35 = vsel %vm447_vm4, %v442_v32, -inf }
 0x246   :  { %v444_v36 = vpop.f32.mrf.mxu1  ;;  %452 = vmax.xlane.f32.xlu1 %v451_v35 }
 0x248   :  { %v3777_v37 = vpop.f32.mrf.mxu1 }
 0x257   :  { %622 = vrot.lane.b32.xlu1 %v4458_v6, %s4288_s23 }
 0x2cb   :  { %v450_v38 = vpop.xlane.xlu0 %449 }
 0x2cc   :  { %v454_v39 = vsub.f32 %v396_v26, %v450_v38 }
 0x2ce   :  { %v456_v40 = vmul.f32 1.442695, %v454_v39 }
 0x2cf   :  { %v453_v41 = vpop.xlane.xlu1 %452 }
 0x2d0   :  { %4172 = vpow2.f32 %v456_v40  ;;  %v455_v42 = vsub.f32 %v442_v32, %v453_v41 }
 0x2d2   :  { %v458_v45 = vmul.f32 1.442695, %v455_v42 }
 0x2d3   :  { %v623_v50 = vpop.permute.xlu1 %622 }
 0x2d4   :  { %4174 = vpow2.f32 %v458_v45  ;;  %v628_v2 = vsel %vm354_vm2, %v623_v50, 0 }
 0x2dd   :  { %v4173_v46 = vpop.eup %4172 }
 0x2de   :  { %v460_v47 = vsel %vm447_vm4, %v4173_v46, 0.0 }
 0x2df   :  { %461 = vadd.xlane.f32.xlu0 %v460_v47 }
 0x2e1   :  { %v4175_v48 = vpop.eup %4174 }
 0x2e2   :  { %v463_v49 = vsel %vm447_vm4, %v4175_v48, 0.0 }
 0x2e3   :  { %464 = vadd.xlane.f32.xlu1 %v463_v49 }
 0x2f4   :  { %567 = vrot.lane.b32.xlu1 %v4464_v9, %s4288_s23 }
 0x2f5   :  { %570 = vrot.lane.b32.xlu0 %v4454_v62, %s4288_s23 }
 0x2f8   :  { %619 = vrot.lane.b32.xlu1 %v4474_v13, %s4288_s23 }
 0x368   :  { %v462_v54 = vpop.xlane.xlu0 %461 }
 0x369   :  { %4176 = vrcp.f32 %v462_v54 }
 0x36c   :  { %v465_v56 = vpop.xlane.xlu1 %464  ;;  %v571_v59 = vpop.permute.xlu0 %570 }
 0x36d   :  { %4178 = vrcp.f32 %v465_v56  ;;  %v576_v63 = vsel %vm354_vm2, %v571_v59, 0 }
 0x370   :  { %v568_v3 = vpop.permute.xlu1 %567 }
 0x374   :  { %v620_v4 = vpop.permute.xlu1 %619 }
 0x376   :  { %v4177_v57 = vpop.eup %4176 }
 0x377   :  { %v468_v58 = vmul.f32 %v4177_v57, %v4173_v46 }
 0x379   :  { %v470_v60 = vpack.c.bf16 %v468_v58, %v468_v58 }
 0x37a   :  { %v4179_v61 = vpop.eup %4178 }
 0x37b   :  { %3781 = vmatmul.mubr.msk.bf16.vlgmr.msra.gmra.mxu0 %vm447_vm4, %v470_v60  ;;  %v469_v0 = vmul.f32 %v4179_v61, %v4175_v48 }
 0x37c   :  { %3791 = vmatpush3.bf16.xpose.msra.mxu0 %v576_v63  ;;  %3792 = vmatprep.mubr.msk.bf16.mxu0 %vm4287_vm1, %v4286_v10  ;;  %v4124_v63 = vld [vmem:[%s5161_s6] sm:$0xff]  }
 0x37d   :  { %v471_v1 = vpack.c.bf16 %v469_v0, %v469_v0  ;;  %3802 = vmatprep.subr.bf16.mxu0 %v4286_v10 }
 0x37f   :  { %3787 = vmatmul.mubr.msk.bf16.vlgmr.msra.gmra.mxu1 %vm447_vm4, %v471_v1 }
 0x380   :  { %3797 = vmatpush3.bf16.xpose.msra.mxu1 %v628_v2  ;;  %3798 = vmatprep.mubr.msk.bf16.mxu1 %vm4287_vm1, %v4286_v10 }
 0x381   :  { %3808 = vmatprep.subr.bf16.mxu1 %v4286_v10 }
 0x383   :  { %3793 = vmatmul.mubr.msk.bf16.vlgmr.msra.gmra.mxu0 %vm354_vm2, %v568_v3 }
 0x384   :  { %3804 = vmatprep.mubr.msk.bf16.mxu0 %vm4287_vm1, %v4286_v10 }
 0x387   :  { %3799 = vmatmul.mubr.msk.bf16.vlgmr.msra.gmra.mxu1 %vm354_vm2, %v620_v4 }
 0x388   :  { %3810 = vmatprep.mubr.msk.bf16.mxu1 %vm4287_vm1, %v4286_v10 }
 0x43b   :  { %v4530_v5 = vpop.f32.mrf.mxu0 }
 0x43d   :  { %v3782_v7 = vpop.f32.mrf.mxu0 }
 0x43e   :  { %v4125_v7 = vld [vmem:[%s5161_s6 + $0x8] sm:$0xff]  }
 0x43f   :  { %v516_v11 = vpop.f32.mrf.mxu0  ;;  %v4532_v12 = vpop.f32.mrf.mxu1 }
 0x440   :  { %v565_v14 = vpack.c.bf16 %v4532_v12, %v4530_v5 }
 0x441   :  { %v3783_v15 = vpop.f32.mrf.mxu0  ;;  %v3788_v16 = vpop.f32.mrf.mxu1 }
 0x443   :  { %v562_v18 = vpop.f32.mrf.mxu1  ;;  %v612_v19 = vpop.f32.mrf.mxu0 }
 0x444   :  { %v613_v20 = vadd.f32 %v4493_v24, %v612_v19 }
 0x445   :  { %v3789_v21 = vpop.f32.mrf.mxu1  ;;  %v3794_v23 = vpop.f32.mrf.mxu0 }
 0x446   :  { %v670_v25 = vsel %vm447_vm4, %v613_v20, -inf }
 0x447   :  { %v664_v26 = vpop.f32.mrf.mxu1  ;;  %671 = vmax.xlane.f32.xlu0 %v670_v25  ;;  %v615_v27 = vpop.f32.mrf.mxu0 }
 0x448   :  { %v665_v29 = vadd.f32 %v4499_v28, %v664_v26 }
 0x449   :  { %v3795_v30 = vpop.f32.mrf.mxu0  ;;  %v3800_v31 = vpop.f32.mrf.mxu1 }
 0x44a   :  { %v673_v32 = vsel %vm447_vm4, %v665_v29, -inf }
 0x44b   :  { %674 = vmax.xlane.f32.xlu1 %v673_v32  ;;  %v667_v33 = vpop.f32.mrf.mxu1 }
 0x44d   :  { %v3801_v34 = vpop.f32.mrf.mxu1 }
 0x45c   :  { %744 = vrot.lane.b32.xlu1 %v4484_v22, %s4288_s23 }
 0x460   :  { %895 = vrot.lane.b32.xlu1 %v4454_v62, %s4289_s24 }
 0x464   :  { %945 = vrot.lane.b32.xlu1 %v4458_v6, %s4289_s24 }
 0x468   :  { %943 = vrot.lane.b32.xlu1 %v4474_v13, %s4289_s24 }
 0x4d0   :  { %v672_v35 = vpop.xlane.xlu0 %671 }
 0x4d1   :  { %v676_v36 = vsub.f32 %v613_v20, %v672_v35 }
 0x4d3   :  { %v678_v37 = vmul.f32 1.442695, %v676_v36 }
 0x4d4   :  { %v675_v38 = vpop.xlane.xlu1 %674 }
 0x4d5   :  { %4180 = vpow2.f32 %v678_v37  ;;  %v677_v39 = vsub.f32 %v665_v29, %v675_v38 }
 0x4d7   :  { %v680_v40 = vmul.f32 1.442695, %v677_v39 }
 0x4d8   :  { %v745_v41 = vpop.permute.xlu1 %744 }
 0x4d9   :  { %4182 = vpow2.f32 %v680_v40  ;;  %v750_v42 = vsel %vm475_vm3, %v745_v41, 0 }
 0x4da   :  { %3809 = vmatpush3.bf16.msra.mxu1 %v750_v42 }
 0x4db   :  { %3820 = vmatprep.subr.bf16.mxu1 %v4286_v10 }
 0x4dc   :  { %v896_v1 = vpop.permute.xlu1 %895 }
 0x4dd   :  { %v901_v19 = vsel %vm354_vm2, %v896_v1, 0 }
 0x4e0   :  { %v946_v2 = vpop.permute.xlu1 %945 }
 0x4e1   :  { %v951_v3 = vsel %vm354_vm2, %v946_v2, 0 }
 0x4e2   :  { %v4181_v45 = vpop.eup %4180 }
 0x4e3   :  { %v682_v46 = vsel %vm447_vm4, %v4181_v45, 0.0 }
 0x4e4   :  { %683 = vadd.xlane.f32.xlu0 %v682_v46  ;;  %v944_v4 = vpop.permute.xlu1 %943 }
 0x4e6   :  { %v4183_v47 = vpop.eup %4182 }
 0x4e7   :  { %v685_v48 = vsel %vm447_vm4, %v4183_v47, 0.0 }
 0x4e8   :  { %686 = vadd.xlane.f32.xlu0 %v685_v48 }
 0x4fe   :  { %695 = vrot.lane.b32.xlu0 %v4480_v17, %s4288_s23 }
 0x502   :  { %893 = vrot.lane.b32.xlu0 %v4464_v9, %s4289_s24 }
 0x56d   :  { %v684_v49 = vpop.xlane.xlu0 %683 }
 0x56e   :  { %4184 = vrcp.f32 %v684_v49 }
 0x571   :  { %v687_v50 = vpop.xlane.xlu0 %686 }
 0x572   :  { %4186 = vrcp.f32 %v687_v50 }
 0x575   :  { %v696_v54 = vpop.permute.xlu0 %695 }
 0x576   :  { %v701_v56 = vsel %vm475_vm3, %v696_v54, 0 }
 0x577   :  { %3803 = vmatpush3.bf16.msra.mxu0 %v701_v56 }
 0x578   :  { %3814 = vmatprep.subr.bf16.mxu0 %v4286_v10 }
 0x579   :  { %v894_v25 = vpop.permute.xlu0 %893 }
 0x57b   :  { %v4185_v57 = vpop.eup %4184 }
 0x57c   :  { %v690_v58 = vmul.f32 %v4185_v57, %v4181_v45 }
 0x57e   :  { %v692_v59 = vpack.c.bf16 %v690_v58, %v690_v58 }
 0x57f   :  { %v4187_v60 = vpop.eup %4186 }
 0x580   :  { %3805 = vmatmul.mubr.msk.bf16.vlgmr.msra.gmra.mxu0 %vm447_vm4, %v692_v59  ;;  %v691_v61 = vmul.f32 %v4187_v60, %v4183_v47 }
 0x581   :  { %3816 = vmatprep.mubr.msk.bf16.mxu0 %vm4287_vm1, %v4286_v10  ;;  %3815 = vmatpush3.bf16.msra.mxu0 %v4125_v7 }
 0x582   :  { %v693_v0 = vpack.c.bf16 %v691_v61, %v691_v61  ;;  %3826 = vmatprep.subr.bf16.mxu0 %v4286_v10 }
 0x584   :  { %3811 = vmatmul.mubr.msk.bf16.vlgmr.msra.gmra.mxu1 %vm447_vm4, %v693_v0 }
 0x585   :  { %3821 = vmatpush3.bf16.msra.mxu1 %v4124_v63  ;;  %3822 = vmatprep.mubr.msk.bf16.mxu1 %vm4287_vm1, %v4286_v10 }
 0x586   :  { %3832 = vmatprep.subr.bf16.mxu1 %v4286_v10 }
 0x58c   :  { %3823 = vmatmul.mubr.msk.bf16.vlgmr.msra.gmra.mxu1 %vm354_vm2, %v565_v14 }
 0x58d   :  { %3833 = vmatpush3.bf16.xpose.msra.mxu1 %v951_v3  ;;  %3834 = vmatprep.mubr.msk.bf16.mxu1 %vm4287_vm1, %v4286_v10 }
 0x58e   :  { %3844 = vmatprep.subr.bf16.mxu1 %v4286_v10 }
 0x594   :  { %3835 = vmatmul.mubr.msk.bf16.vlgmr.msra.gmra.mxu1 %vm354_vm2, %v944_v4 }
 0x595   :  { %3846 = vmatprep.mubr.msk.bf16.mxu1 %vm4287_vm1, %v4286_v10 }
 0x640   :  { %v737_v5 = vpop.f32.mrf.mxu0 }
 0x642   :  { %v3806_v11 = vpop.f32.mrf.mxu0 }
 0x644   :  { %v740_v12 = vpop.f32.mrf.mxu0  ;;  %v786_v14 = vpop.f32.mrf.mxu1 }
 0x645   :  { %v792_v15 = vpack.c.bf16 %v786_v14, %v737_v5 }
 0x646   :  { %v3807_v16 = vpop.f32.mrf.mxu0  ;;  %v3812_v18 = vpop.f32.mrf.mxu1 }
 0x647   :  { %3817 = vmatmul.mubr.msk.bf16.vlgmr.msra.gmra.mxu0 %vm354_vm2, %v792_v15 }
 0x648   :  { %3827 = vmatpush3.bf16.xpose.msra.mxu0 %v901_v19  ;;  %v789_v20 = vpop.f32.mrf.mxu1  ;;  %3828 = vmatprep.mubr.msk.bf16.mxu0 %vm4287_vm1, %v4286_v10 }
 0x649   :  { %3838 = vmatprep.subr.bf16.mxu0 %v4286_v10  ;;  %v4126_v20 = vld [vmem:[%s5161_s6 + $0x10] sm:$0xff]  }
 0x64a   :  { %v3813_v21 = vpop.f32.mrf.mxu1 }
 0x64c   :  { %v4588_v23 = vpop.f32.mrf.mxu1 }
 0x64e   :  { %v3824_v26 = vpop.f32.mrf.mxu1 }
 0x64f   :  { %3829 = vmatmul.mubr.msk.bf16.vlgmr.msra.gmra.mxu0 %vm354_vm2, %v894_v25 }
 0x650   :  { %v4591_v27 = vpop.f32.mrf.mxu1  ;;  %3840 = vmatprep.mubr.msk.bf16.mxu0 %vm4287_vm1, %v4286_v10 }
 0x652   :  { %v3825_v29 = vpop.f32.mrf.mxu1 }
 0x654   :  { %v987_v30 = vpop.f32.mrf.mxu1 }
 0x655   :  { %v988_v31 = vadd.f32 %v4499_v28, %v987_v30 }
 0x656   :  { %v3836_v32 = vpop.f32.mrf.mxu1 }
 0x657   :  { %v996_v33 = vsel %vm447_vm4, %v988_v31, -inf }
 0x658   :  { %997 = vmax.xlane.f32.xlu1 %v996_v33  ;;  %v990_v34 = vpop.f32.mrf.mxu1 }
 0x65a   :  { %v3837_v35 = vpop.f32.mrf.mxu1 }
 0x669   :  { %1065 = vrot.lane.b32.xlu1 %v4484_v22, %s4289_s24 }
 0x66d   :  { %1168 = vrot.lane.b32.xlu1 %v4454_v62, %s4290_s29 }
 0x671   :  { %1218 = vrot.lane.b32.xlu1 %v4458_v6, %s4290_s29 }
 0x675   :  { %1216 = vrot.lane.b32.xlu1 %v4474_v13, %s4290_s29 }
 0x6e1   :  { %v998_v36 = vpop.xlane.xlu1 %997 }
 0x6e2   :  { %v1000_v39 = vsub.f32 %v988_v31, %v998_v36 }
 0x6e4   :  { %v1003_v40 = vmul.f32 1.442695, %v1000_v39 }
 0x6e5   :  { %v1066_v37 = vpop.permute.xlu1 %1065 }
 0x6e6   :  { %v1071_v38 = vsel %vm475_vm3, %v1066_v37, 0  ;;  %4188 = vpow2.f32 %v1003_v40 }
 0x6e7   :  { %3845 = vmatpush3.bf16.msra.mxu1 %v1071_v38 }
 0x6e8   :  { %3856 = vmatprep.subr.bf16.mxu1 %v4286_v10 }
 0x6e9   :  { %v1169_v1 = vpop.permute.xlu1 %1168 }
 0x6ea   :  { %v1174_v3 = vsel %vm354_vm2, %v1169_v1, 0 }
 0x6ed   :  { %v1219_v32 = vpop.permute.xlu1 %1218 }
 0x6ee   :  { %v1224_v36 = vsel %vm354_vm2, %v1219_v32, 0 }
 0x6f1   :  { %v1217_v38 = vpop.permute.xlu1 %1216 }
 0x6f3   :  { %v4189_v48 = vpop.eup %4188 }
 0x6f4   :  { %v1008_v54 = vsel %vm447_vm4, %v4189_v48, 0.0 }
 0x707   :  { %v4607_v41 = vpop.f32.mrf.mxu0 }
 0x709   :  { %v3818_v42 = vpop.f32.mrf.mxu0 }
 0x70b   :  { %v4609_v62 = vpop.f32.mrf.mxu0 }
 0x70d   :  { %v3819_v45 = vpop.f32.mrf.mxu0 }
 0x70f   :  { %v937_v6 = vpop.f32.mrf.mxu0 }
 0x710   :  { %v938_v46 = vadd.f32 %v4493_v24, %v937_v6 }
 0x711   :  { %v3830_v13 = vpop.f32.mrf.mxu0 }
 0x712   :  { %v993_v47 = vsel %vm447_vm4, %v938_v46, -inf }
 0x713   :  { %994 = vmax.xlane.f32.xlu0 %v993_v47  ;;  %v940_v49 = vpop.f32.mrf.mxu0 }
 0x714   :  { %v890_v49 = vadd.f32 %v4591_v27, %v4609_v62 }
 0x715   :  { %v3831_v50 = vpop.f32.mrf.mxu0 }
 0x717   :  { %1009 = vadd.xlane.f32.xlu0 %v1008_v54 }
 0x79c   :  { %v995_v56 = vpop.xlane.xlu0 %994 }
 0x79d   :  { %v999_v57 = vsub.f32 %v938_v46, %v995_v56  ;;  %v887_v46 = vadd.f32 %v4588_v23, %v4607_v41 }
 0x79f   :  { %v1001_v58 = vmul.f32 1.442695, %v999_v57 }
 0x7a0   :  { %v1010_v59 = vpop.xlane.xlu0 %1009 }
 0x7a1   :  { %4190 = vpow2.f32 %v1001_v58 }
 0x7a2   :  { %4192 = vrcp.f32 %v1010_v59 }
 0x7ae   :  { %v4191_v60 = vpop.eup %4190 }
 0x7af   :  { %v4193_v61 = vpop.eup %4192  ;;  %v1005_v63 = vsel %vm447_vm4, %v4191_v60, 0.0 }
 0x7b0   :  { %1006 = vadd.xlane.f32.xlu0 %v1005_v63  ;;  %v1014_v0 = vmul.f32 %v4193_v61, %v4189_v48 }
 0x7b2   :  { %v1016_v2 = vpack.c.bf16 %v1014_v0, %v1014_v0 }
 0x7b4   :  { %3847 = vmatmul.mubr.msk.bf16.vlgmr.msra.gmra.mxu1 %vm447_vm4, %v1016_v2 }
 0x7b5   :  { %3857 = vmatpush3.bf16.xpose.msra.mxu1 %v1174_v3  ;;  %3858 = vmatprep.mubr.msk.bf16.mxu1 %vm4287_vm1, %v4286_v10 }
 0x7b6   :  { %3868 = vmatprep.subr.bf16.mxu1 %v4286_v10 }
 0x7c6   :  { %1017 = vrot.lane.b32.xlu0 %v4480_v17, %s4289_s24 }
 0x7ca   :  { %1166 = vrot.lane.b32.xlu0 %v4464_v9, %s4290_s29 }
 0x839   :  { %v1007_v4 = vpop.xlane.xlu0 %1006 }
 0x83a   :  { %4194 = vrcp.f32 %v1007_v4 }
 0x83d   :  { %v1018_v7 = vpop.permute.xlu0 %1017 }
 0x83e   :  { %v1023_v5 = vsel %vm475_vm3, %v1018_v7, 0 }
 0x83f   :  { %3839 = vmatpush3.bf16.msra.mxu0 %v1023_v5 }
 0x840   :  { %3850 = vmatprep.subr.bf16.mxu0 %v4286_v10 }
 0x841   :  { %v1167_v11 = vpop.permute.xlu0 %1166 }
 0x842   :  { %3859 = vmatmul.mubr.msk.bf16.vlgmr.msra.gmra.mxu1 %vm354_vm2, %v1167_v11 }
 0x843   :  { %3870 = vmatprep.mubr.msk.bf16.mxu1 %vm4287_vm1, %v4286_v10 }
 0x847   :  { %v4195_v12 = vpop.eup %4194 }
 0x848   :  { %v1013_v14 = vmul.f32 %v4195_v12, %v4191_v60 }
 0x84a   :  { %v1015_v15 = vpack.c.bf16 %v1013_v14, %v1013_v14 }
 0x84c   :  { %3841 = vmatmul.mubr.msk.bf16.vlgmr.msra.gmra.mxu0 %vm447_vm4, %v1015_v15  ;;  %v4127_v15 = vld [vmem:[%s5161_s6 + $0x18] sm:$0xff]  }
 0x84d   :  { %3852 = vmatprep.mubr.msk.bf16.mxu0 %vm4287_vm1, %v4286_v10  ;;  %3851 = vmatpush3.bf16.msra.mxu0 %v4126_v20 }
 0x84e   :  { %3862 = vmatprep.subr.bf16.mxu0 %v4286_v10 }
 0x874   :  { %v1107_v9 = vpop.f32.mrf.mxu1 }
 0x876   :  { %v3848_v16 = vpop.f32.mrf.mxu1 }
 0x878   :  { %v1110_v18 = vpop.f32.mrf.mxu1 }
 0x87a   :  { %v3849_v19 = vpop.f32.mrf.mxu1 }
 0x902   :  { %v1210_v21 = vpop.f32.mrf.mxu1 }
 0x903   :  { %v1211_v25 = vadd.f32 %v4493_v24, %v1210_v21 }
 0x904   :  { %v3860_v26 = vpop.f32.mrf.mxu1 }
 0x905   :  { %v1266_v29 = vsel %vm447_vm4, %v1211_v25, -inf }
 0x906   :  { %1267 = vmax.xlane.f32.xlu0 %v1266_v29  ;;  %v1213_v30 = vpop.f32.mrf.mxu1 }
 0x907   :  { %v1443_v30 = vsub.s32 3, %v4439_v51 }
 0x908   :  { %v3861_v31 = vpop.f32.mrf.mxu1 }
 0x90c   :  { %v1059_v33 = vpop.f32.mrf.mxu0 }
 0x90d   :  { %v1113_v34 = vpack.c.bf16 %v1107_v9, %v1059_v33  ;;  %v1444_v33 = vrot.slane %v4445_v53, %v1443_v30 }
 0x90e   :  { %v3842_v35 = vpop.f32.mrf.mxu0 }
 0x90f   :  { %3853 = vmatmul.mubr.msk.bf16.vlgmr.msra.gmra.mxu0 %vm354_vm2, %v1113_v34 }
 0x910   :  { %3863 = vmatpush3.bf16.xpose.msra.mxu0 %v1224_v36  ;;  %v1062_v37 = vpop.f32.mrf.mxu0  ;;  %3864 = vmatprep.mubr.msk.bf16.mxu0 %vm4287_vm1, %v4286_v10 }
 0x911   :  { %3874 = vmatprep.subr.bf16.mxu0 %v4286_v10 }
 0x912   :  { %v3843_v24 = vpop.f32.mrf.mxu0 }
 0x917   :  { %3865 = vmatmul.mubr.msk.bf16.vlgmr.msra.gmra.mxu0 %vm354_vm2, %v1217_v38 }
 0x918   :  { %3876 = vmatprep.mubr.msk.bf16.mxu0 %vm4287_vm1, %v4286_v10 }
 0x98f   :  { %v1268_v39 = vpop.xlane.xlu0 %1267 }
 0x990   :  { %v1272_v40 = vsub.f32 %v1211_v25, %v1268_v39 }
 0x992   :  { %v1274_v42 = vmul.f32 1.442695, %v1272_v40 }
 0x994   :  { %4196 = vpow2.f32 %v1274_v42 }
 0x9a1   :  { %v4197_v45 = vpop.eup %4196 }
 0x9a2   :  { %v1278_v6 = vsel %vm447_vm4, %v4197_v45, 0.0 }
 0x9a3   :  { %1279 = vadd.xlane.f32.xlu0 %v1278_v6 }
 0x9cf   :  { %v1157_v13 = vpop.f32.mrf.mxu0 }
 0x9d0   :  { %v1164_v47 = vadd.f32 %v1157_v13, %v887_v46 }
 0x9d1   :  { %v3854_v48 = vpop.f32.mrf.mxu0 }
 0x9d2   :  { %v4130_v48 = vld [vmem:[%s5162_s7 + $0x8] sm:$0xff]  }
 0x9d3   :  { %v1160_v50 = vpop.f32.mrf.mxu0 }
 0x9d4   :  { %v1165_v54 = vadd.f32 %v1160_v50, %v890_v49  ;;  %v4131_v49 = vld [vmem:[%s5162_s7] sm:$0xff]  }
 0x9d5   :  { %v3855_v56 = vpop.f32.mrf.mxu0 }
 0x9d7   :  { %v1260_v57 = vpop.f32.mrf.mxu0 }
 0x9d8   :  { %v1261_v58 = vadd.f32 %v4499_v28, %v1260_v57 }
 0x9d9   :  { %v3866_v59 = vpop.f32.mrf.mxu0 }
 0x9da   :  { %v1269_v60 = vsel %vm447_vm4, %v1261_v58, -inf }
 0x9db   :  { %1270 = vmax.xlane.f32.xlu1 %v1269_v60  ;;  %v1263_v61 = vpop.f32.mrf.mxu0 }
 0x9dd   :  { %v3867_v63 = vpop.f32.mrf.mxu0 }
 0x9ec   :  { %1338 = vrot.lane.b32.xlu1 %v4484_v22, %s4290_s29 }
 0xa2c   :  { %v1280_v2 = vpop.xlane.xlu0 %1279 }
 0xa64   :  { %v1271_v23 = vpop.xlane.xlu1 %1270 }
 0xa65   :  { %v1273_v41 = vsub.f32 %v1261_v58, %v1271_v23 }
 0xa67   :  { %v1276_v0 = vmul.f32 1.442695, %v1273_v41 }
 0xa68   :  { %v1339_v1 = vpop.permute.xlu1 %1338 }
 0xa69   :  { %4198 = vpow2.f32 %v1276_v0  ;;  %v1344_v27 = vsel %vm475_vm3, %v1339_v1, 0 }
 0xa6a   :  { %3875 = vmatpush3.bf16.msra.mxu0 %v1344_v27  ;;  %4200 = vrcp.f32 %v1280_v2  ;;  %v1481_v2 = vsub.s32 4, %v4439_v51 }
 0xa6b   :  { %3886 = vmatprep.subr.bf16.mxu0 %v4286_v10 }
 0xa76   :  { %v4199_v28 = vpop.eup %4198 }
 0xa77   :  { %v1281_v62 = vsel %vm447_vm4, %v4199_v28, 0.0  ;;  %v4201_v22 = vpop.eup %4200 }
 0xa78   :  { %1282 = vadd.xlane.f32.xlu0 %v1281_v62  ;;  %v1286_v4 = vmul.f32 %v4201_v22, %v4197_v45 }
 0xa7a   :  { %v1288_v11 = vpack.c.bf16 %v1286_v4, %v1286_v4  ;;  %v1487_v4 = vsub.s32 5, %v4439_v51 }
 0xa8e   :  { %1290 = vrot.lane.b32.xlu0 %v4480_v17, %s4290_s29 }
 0xb01   :  { %v1283_v3 = vpop.xlane.xlu0 %1282 }
 0xb02   :  { %4202 = vrcp.f32 %v1283_v3  ;;  %v1482_v3 = vrot.slane %v4445_v53, %v1481_v2 }
 0xb05   :  { %v1291_v7 = vpop.permute.xlu0 %1290 }
 0xb06   :  { %v1296_v5 = vsel %vm475_vm3, %v1291_v7, 0 }
 0xb07   :  { %3869 = vmatpush3.bf16.msra.mxu1 %v1296_v5 }
 0xb08   :  { %3880 = vmatprep.subr.bf16.mxu1 %v4286_v10 }
 0xb0a   :  { %3871 = vmatmul.mubr.msk.bf16.vlgmr.msra.gmra.mxu1 %vm447_vm4, %v1288_v11 }
 0xb0b   :  { %3882 = vmatprep.mubr.msk.bf16.mxu1 %vm4287_vm1, %v4286_v10  ;;  %3881 = vmatpush3.bf16.msra.mxu1 %v4127_v15  ;;  %v1488_v15 = vrot.slane %v4445_v53, %v1487_v4 }
 0xb0c   :  { %3898 = vmatprep.subr.bf16.mxu1 %v4286_v10 }
 0xb0f   :  { %v4203_v12 = vpop.eup %4202 }
 0xb10   :  { %v1287_v17 = vmul.f32 %v4203_v12, %v4199_v28 }
 0xb12   :  { %v1289_v14 = vpack.c.bf16 %v1287_v17, %v1287_v17 }
 0xb14   :  { %3877 = vmatmul.mubr.msk.bf16.vlgmr.msra.gmra.mxu0 %vm447_vm4, %v1289_v14 }
 0xb15   :  { %3894 = vmatprep.mubr.msk.bf16.mxu0 %vm4287_vm1, %v4286_v10 }
 0xbca   :  { %v1332_v9 = vpop.f32.mrf.mxu1 }
 0xbcc   :  { %v3872_v16 = vpop.f32.mrf.mxu1 }
 0xbce   :  { %v1335_v18 = vpop.f32.mrf.mxu1 }
 0xbd0   :  { %v3873_v19 = vpop.f32.mrf.mxu1 }
 0xbd4   :  { %v1380_v20 = vpop.f32.mrf.mxu0 }
 0xbd5   :  { %v1386_v21 = vpack.c.bf16 %v1380_v20, %v1332_v9  ;;  %v4132_v20 = vld [vmem:[%s5163_s8 + $0x38] sm:$0xff]  }
 0xbd6   :  { %v3878_v25 = vpop.f32.mrf.mxu0 }
 0xbd7   :  { %3883 = vmatmul.mubr.msk.bf16.vlgmr.msra.gmra.mxu1 %vm354_vm2, %v1386_v21  ;;  %v4133_v21 = vld [vmem:[%s5163_s8 + $0x30] sm:$0xff]   ;;  %v4134_v25 = vld [vmem:[%s5163_s8 + $0x28] sm:$0xff]  }
 0xbd8   :  { %v1383_v26 = vpop.f32.mrf.mxu0  ;;  %3914 = vmatprep.mubr.msk.bf16.mxu1 %vm4287_vm1, %v4286_v10  ;;  %3899 = vmatpush3.bf16.msra.mxu1 %v4132_v20  ;;  %v4146_v20 = vld [vmem:[%s5158_s3 + $0x60] sm:$0xff]  }
 0xbd9   :  { %3900 = vmatprep.subr.bf16.mxu1 %v4286_v10  ;;  %v4135_v26 = vld [vmem:[%s5163_s8 + $0x20] sm:$0xff]  }
 0xbda   :  { %v3879_v29 = vpop.f32.mrf.mxu0 }
 0xbdb   :  { %v4136_v29 = vld [vmem:[%s5163_s8 + $0x18] sm:$0xff]  }
 0xbdc   :  { %3901 = vmatpush3.bf16.msra.mxu1 %v4133_v21  ;;  %v4147_v21 = vld [vmem:[%s5158_s3 + $0xa0] sm:$0xff]  }
 0xbdd   :  { %3902 = vmatprep.subr.bf16.mxu1 %v4286_v10 }
 0xbe0   :  { %3903 = vmatpush3.bf16.msra.mxu1 %v4134_v25 }
 0xbe1   :  { %3904 = vmatprep.subr.bf16.mxu1 %v4286_v10 }
 0xbe4   :  { %3905 = vmatpush3.bf16.msra.mxu1 %v4135_v26 }
 0xbe5   :  { %3906 = vmatprep.subr.bf16.mxu1 %v4286_v10 }
 0xbe8   :  { %3907 = vmatpush3.bf16.msra.mxu1 %v4136_v29 }
 0xbe9   :  { %3908 = vmatprep.subr.bf16.mxu1 %v4286_v10 }
 0xc97   :  { %v1430_v31 = vpop.f32.mrf.mxu1 }
 0xc98   :  { %v1437_v32 = vadd.f32 %v1430_v31, %v1164_v47  ;;  %v4128_v47 = vld [vmem:[%s5162_s7 + $0x18] sm:$0xff]   ;;  %v4137_v31 = vld [vmem:[%s5163_s8 + $0x10] sm:$0xff]  }
 0xc99   :  { %v3884_v34 = vpop.f32.mrf.mxu1  ;;  %3887 = vmatpush3.bf16.msra.mxu0 %v4128_v47  ;;  %3909 = vmatpush3.bf16.msra.mxu1 %v4137_v31 }
 0xc9a   :  { %v1439_v35 = vadd.f32 %v1437_v32, %v4408_v43  ;;  %3888 = vmatprep.subr.bf16.mxu0 %v4286_v10  ;;  %3910 = vmatprep.subr.bf16.mxu1 %v4286_v10  ;;  %v4138_v32 = vld [vmem:[%s5163_s8 + $0x8] sm:$0xff]   ;;  %v3464_v34 = vld [vmem:[%s5160_s5] ss:$0 sm:$0xff] }
 0xc9b   :  { %v1433_v36 = vpop.f32.mrf.mxu1 }
 0xc9c   :  { %v1445_v37 = vadd.f32 %v1444_v33, %v1439_v35  ;;  %v1438_v24 = vadd.f32 %v1433_v36, %v1165_v54 }
 0xc9d   :  { %v3885_v38 = vpop.f32.mrf.mxu1  ;;  %3911 = vmatpush3.bf16.msra.mxu1 %v4138_v32 }
 0xc9e   :  { %v1440_v39 = vadd.f32 %v1438_v24, %v4410_v44  ;;  %v1447_v40 = vsel %vm41_vm0, %v1445_v37, 0.0  ;;  %v1455_v46 = vmul.f32 %v1445_v37, %v1445_v37  ;;  %v4129_v44 = vld [vmem:[%s5162_s7 + $0x10] sm:$0xff]   ;;  %3912 = vmatprep.subr.bf16.mxu1 %v4286_v10 }
 0xc9f   :  { %1448 = vadd.xlane.f32.xlu1 %v1447_v40  ;;  %3889 = vmatpush3.bf16.msra.mxu0 %v4129_v44 }
 0xca0   :  { %v1446_v42 = vadd.f32 %v1444_v33, %v1440_v39  ;;  %v1457_v43 = vsel %vm41_vm0, %v1455_v46, 0.0  ;;  %3890 = vmatprep.subr.bf16.mxu0 %v4286_v10  ;;  %v4139_v33 = vld [vmem:[%s5163_s8] sm:$0xff]  }
 0xca1   :  { %3913 = vmatpush3.bf16.msra.mxu1 %v4139_v33 }
 0xca2   :  { %v1450_v45 = vsel %vm41_vm0, %v1446_v42, 0.0  ;;  %v1456_v6 = vmul.f32 %v1446_v42, %v1446_v42  ;;  %3942 = vmatprep.subr.bf16.mxu1 %v4286_v10 }
 0xca3   :  { %1451 = vadd.xlane.f32.xlu0 %v1450_v45  ;;  %3891 = vmatpush3.bf16.msra.mxu0 %v4130_v48 }
 0xca4   :  { %v1460_v13 = vsel %vm41_vm0, %v1456_v6, 0.0  ;;  %3892 = vmatprep.subr.bf16.mxu0 %v4286_v10 }
 0xca5   :  { %1461 = vadd.xlane.f32.xlu1 %v1460_v13 }
 0xca7   :  { %1458 = vadd.xlane.f32.xlu0 %v1457_v43  ;;  %3893 = vmatpush3.bf16.msra.mxu0 %v4131_v49 }
 0xca8   :  { %3918 = vmatprep.subr.bf16.mxu0 %v4286_v10 }
 0xd28   :  { %v1449_v50 = vpop.xlane.xlu1 %1448 }
 0xd29   :  { %v1453_v56 = vmul.f32 0.015625, %v1449_v50 }
 0xd2b   :  { %v1465_v63 = vmul.f32 %v1453_v56, %v1453_v56  ;;  %v1471_v5 = vsub.f32 %v1445_v37, %v1453_v56 }
 0xd2c   :  { %v1452_v54 = vpop.xlane.xlu0 %1451 }
 0xd2d   :  { %v1454_v57 = vmul.f32 0.015625, %v1452_v54 }
 0xd2e   :  { %v1462_v58 = vpop.xlane.xlu1 %1461 }
 0xd2f   :  { %v1466_v59 = vmul.f32 %v1454_v57, %v1454_v57  ;;  %v1464_v60 = vmul.f32 0.015625, %v1462_v58  ;;  %v1472_v22 = vsub.f32 %v1446_v42, %v1454_v57 }
 0xd30   :  { %v1459_v61 = vpop.xlane.xlu0 %1458 }
 0xd31   :  { %v1468_v23 = vsub.f32 %v1464_v60, %v1466_v59  ;;  %v1463_v41 = vmul.f32 0.015625, %v1459_v61 }
 0xd33   :  { %v1470_v0 = vmax.f32 %v1468_v23, 0.0  ;;  %v1467_v1 = vsub.f32 %v1463_v41, %v1465_v63  ;;  %v1612_v63 = vsub.s32 6, %v4439_v51 }
 0xd35   :  { %v1474_v27 = vadd.f32 1e-12, %v1470_v0  ;;  %v1469_v28 = vmax.f32 %v1467_v1, 0.0  ;;  %v1613_v23 = vrot.slane %v4445_v53, %v1612_v63 }
 0xd37   :  { %4204 = vrsqrt.f32 %v1474_v27  ;;  %v1473_v62 = vadd.f32 1e-12, %v1469_v28 }
 0xd39   :  { %4206 = vrsqrt.f32 %v1473_v62 }
 0xd44   :  { %v4205_v7 = vpop.eup %4204 }
 0xd45   :  { %v1478_v11 = vmul.f32 %v4205_v7, %v1472_v22 }
 0xd46   :  { %v4207_v12 = vpop.eup %4206 }
 0xd47   :  { %v1477_v17 = vmul.f32 %v4207_v12, %v1471_v5  ;;  %v1484_v14 = vmul.f32 %v1482_v3, %v1478_v11 }
 0xd49   :  { %v1483_v9 = vmul.f32 %v1482_v3, %v1477_v17  ;;  %v4711_v18 = vadd.f32 %v1488_v15, %v1484_v14  ;;  %v4140_v14 = vld [vmem:[%s5158_s3 + $0x78] sm:$0xff]  }
 0xd4b   :  { %v4709_v16 = vadd.f32 %v1488_v15, %v1483_v9  ;;  %v4141_v15 = vld [vmem:[%s5158_s3 + $0xb8] sm:$0xff]   ;;  %v4142_v9 = vld [vmem:[%s5158_s3 + $0x70] sm:$0xff]  }
 0xd4d   :  { %v1491_v19 = vpack.c.bf16 %v4711_v18, %v4709_v16 }
 0xd4f   :  { %3895 = vmatmul.mubr.msk.bf16.vlgmr.msra.gmra.mxu0 %vm41_vm0, %v1491_v19  ;;  %v4145_v19 = vld [vmem:[%s5158_s3 + $0xa8] sm:$0xff]  }
 0xd50   :  { %3926 = vmatprep.mubr.msk.bf16.mxu0 %vm4287_vm1, %v4286_v10  ;;  %3919 = vmatpush3.bf16.msra.mxu0 %v4140_v14 }
 0xd51   :  { %3920 = vmatprep.subr.bf16.mxu0 %v4286_v10 }
 0xd54   :  { %3921 = vmatpush3.bf16.msra.mxu0 %v4142_v9 }
 0xd55   :  { %3922 = vmatprep.subr.bf16.mxu0 %v4286_v10 }
 0xe0f   :  { %v1568_v35 = vpop.f32.mrf.mxu0 }
 0xe10   :  { %v1569_v36 = vadd.f32 %v3464_v34, %v1568_v35 }
 0xe11   :  { %v3896_v37 = vpop.f32.mrf.mxu0 }
 0xe12   :  { %v1575_v24 = vmul.f32 %v1569_v36, %v1569_v36 }
 0xe13   :  { %v1571_v38 = vpop.f32.mrf.mxu0 }
 0xe14   :  { %v1577_v39 = vmul.f32 %v1575_v24, %v1569_v36  ;;  %v1572_v40 = vadd.f32 %v3464_v34, %v1571_v38 }
 0xe15   :  { %v3897_v42 = vpop.f32.mrf.mxu0 }
 0xe16   :  { %v1579_v45 = vmul.f32 0.044715, %v1577_v39  ;;  %v1576_v6 = vmul.f32 %v1572_v40, %v1572_v40 }
 0xe18   :  { %v1581_v46 = vadd.f32 %v1579_v45, %v1569_v36  ;;  %v1578_v13 = vmul.f32 %v1576_v6, %v1572_v40  ;;  %v1739_v6 = vsub.s32 7, %v4439_v51 }
 0xe1a   :  { %v1583_v43 = vmul.f32 0.7978846, %v1581_v46  ;;  %v1580_v47 = vmul.f32 0.044715, %v1578_v13 }
 0xe1c   :  { %4208 = vtanh.f32 %v1583_v43  ;;  %v1582_v44 = vadd.f32 %v1580_v47, %v1572_v40  ;;  %v4260_v47 = vld [vmem:[%s5159_s4] sm:$0xff] }
 0xe1e   :  { %v1584_v48 = vmul.f32 0.7978846, %v1582_v44  ;;  %v1740_v44 = vrot.slane %v4260_v47, %v1739_v6 }
 0xe20   :  { %4210 = vtanh.f32 %v1584_v48 }
 0xe29   :  { %v4209_v49 = vpop.eup %4208 }
 0xe2a   :  { %v1587_v50 = vadd.f32 1.0, %v4209_v49 }
 0xe2c   :  { %v1589_v56 = vmul.f32 0.5, %v1587_v50 }
 0xe2d   :  { %v4211_v54 = vpop.eup %4210 }
 0xe2e   :  { %v1588_v57 = vadd.f32 1.0, %v4211_v54  ;;  %v1591_v59 = vmul.f32 %v1589_v56, %v1569_v36  ;;  %v3478_v56 = vld [vmem:[%s5159_s4 + $0x8] ss:$0 sm:$0xff] }
 0xe30   :  { %v1590_v58 = vmul.f32 0.5, %v1588_v57 }
 0xe32   :  { %v1592_v60 = vmul.f32 %v1590_v58, %v1572_v40 }
 0xe34   :  { %v1593_v61 = vpack.c.bf16 %v1592_v60, %v1591_v59  ;;  %v4148_v60 = vld [vmem:[%s5158_s3 + $0x98] sm:$0xff]  }
 0xe36   :  { %3915 = vmatmul.mubr.bf16.vlgmr.msra.gmra.mxu1 %v1593_v61 }
 0xe37   :  { %3950 = vmatprep.mubr.msk.bf16.mxu1 %vm4287_vm1, %v4286_v10  ;;  %3943 = vmatpush3.bf16.msra.mxu1 %v4141_v15 }
 0xe38   :  { %3944 = vmatprep.subr.bf16.mxu1 %v4286_v10 }
 0xef6   :  { %v1696_v41 = vpop.f32.mrf.mxu1 }
 0xef7   :  { %v1697_v0 = vadd.f32 %v1696_v41, %v1613_v23  ;;  %v4150_v41 = vld [vmem:[%s5158_s3 + $0x88] sm:$0xff]  }
 0xef8   :  { %v3916_v1 = vpop.f32.mrf.mxu1 }
 0xef9   :  { %v1703_v27 = vadd.f32 %v1697_v0, %v4709_v16  ;;  %v4143_v16 = vld [vmem:[%s5158_s3 + $0xb0] sm:$0xff]   ;;  %v4151_v0 = vld [vmem:[%s5158_s3 + $0x80] sm:$0xff]  }
 0xefa   :  { %v1699_v28 = vpop.f32.mrf.mxu1  ;;  %3945 = vmatpush3.bf16.msra.mxu1 %v4143_v16 }
 0xefb   :  { %v1700_v62 = vadd.f32 %v1699_v28, %v1613_v23  ;;  %v1705_v22 = vsel %vm41_vm0, %v1703_v27, 0.0  ;;  %v1713_v3 = vmul.f32 %v1703_v27, %v1703_v27  ;;  %3946 = vmatprep.subr.bf16.mxu1 %v4286_v10  ;;  %v4149_v23 = vld [vmem:[%s5158_s3 + $0x90] sm:$0xff]  }
 0xefc   :  { %1706 = vadd.xlane.f32.xlu0 %v1705_v22  ;;  %v3917_v7 = vpop.f32.mrf.mxu1 }
 0xefd   :  { %v1704_v5 = vadd.f32 %v1700_v62, %v4711_v18  ;;  %v1715_v11 = vsel %vm41_vm0, %v1713_v3, 0.0  ;;  %v4144_v18 = vld [vmem:[%s5158_s3 + $0x68] sm:$0xff]  }
 0xefe   :  { %3923 = vmatpush3.bf16.msra.mxu0 %v4144_v18  ;;  %3947 = vmatpush3.bf16.msra.mxu1 %v4145_v19 }
 0xeff   :  { %v1708_v12 = vsel %vm41_vm0, %v1704_v5, 0.0  ;;  %v1714_v17 = vmul.f32 %v1704_v5, %v1704_v5  ;;  %3924 = vmatprep.subr.bf16.mxu0 %v4286_v10  ;;  %3948 = vmatprep.subr.bf16.mxu1 %v4286_v10 }
 0xf00   :  { %1716 = vadd.xlane.f32.xlu0 %v1715_v11  ;;  %1709 = vadd.xlane.f32.xlu1 %v1708_v12  ;;  %v4840_v11 = vld [vmem:[%s5159_s4 + $0x10] sm:$0xff] }
 0xf01   :  { %v1718_v53 = vsel %vm41_vm0, %v1714_v17, 0.0  ;;  %v1864_v12 = vrot.slane %v4840_v11, %v202_v52  ;;  %v1790_v9 = vrot.slane %v4840_v11, %v128_v55 }
 0xf02   :  { %3925 = vmatpush3.bf16.msra.mxu0 %v4146_v20  ;;  %3949 = vmatpush3.bf16.msra.mxu1 %v4147_v21 }
 0xf03   :  { %3930 = vmatprep.subr.bf16.mxu0 %v4286_v10  ;;  %3960 = vmatprep.subr.bf16.mxu1 %v4286_v10 }
 0xf04   :  { %1719 = vadd.xlane.f32.xlu1 %v1718_v53  ;;  %v1935_v53 = vrot.slane %v4840_v11, %v273_v8 }
 0xf85   :  { %v1707_v25 = vpop.xlane.xlu0 %1706 }
 0xf86   :  { %v1711_v26 = vmul.f32 0.015625, %v1707_v25 }
 0xf88   :  { %v1723_v32 = vmul.f32 %v1711_v26, %v1711_v26  ;;  %v1729_v46 = vsub.f32 %v1703_v27, %v1711_v26 }
 0xf89   :  { %v1717_v29 = vpop.xlane.xlu0 %1716  ;;  %v1710_v31 = vpop.xlane.xlu1 %1709 }
 0xf8a   :  { %v1721_v33 = vmul.f32 0.015625, %v1717_v29  ;;  %v1712_v34 = vmul.f32 0.015625, %v1710_v31 }
 0xf8c   :  { %v1725_v35 = vsub.f32 %v1721_v33, %v1723_v32  ;;  %v1724_v24 = vmul.f32 %v1712_v34, %v1712_v34  ;;  %v1730_v48 = vsub.f32 %v1704_v5, %v1712_v34 }
 0xf8d   :  { %v1720_v36 = vpop.xlane.xlu1 %1719 }
 0xf8e   :  { %v1727_v37 = vmax.f32 %v1725_v35, 0.0  ;;  %v1722_v38 = vmul.f32 0.015625, %v1720_v36 }
 0xf90   :  { %v1731_v39 = vadd.f32 1e-12, %v1727_v37  ;;  %v1726_v40 = vsub.f32 %v1722_v38, %v1724_v24  ;;  %v4886_v24 = vld [vmem:[%s5156_s1] ss:$0 sm:$0xff] }
 0xf92   :  { %4212 = vrsqrt.f32 %v1731_v39  ;;  %v1728_v42 = vmax.f32 %v1726_v40, 0.0 }
 0xf94   :  { %v1732_v45 = vadd.f32 1e-12, %v1728_v42 }
 0xf96   :  { %4214 = vrsqrt.f32 %v1732_v45 }
 0xf9f   :  { %v4213_v13 = vpop.eup %4212 }
 0xfa0   :  { %v1735_v43 = vmul.f32 %v4213_v13, %v1729_v46  ;;  %v4893_v46 = vld [vmem:[%s5156_s1 + $0x1] ss:$0 sm:$0xff] }
 0xfa2   :  { %v1741_v54 = vmul.f32 %v1740_v44, %v1735_v43 }
 0xfa3   :  { %v4215_v49 = vpop.eup %4214 }
 0xfa4   :  { %v1736_v50 = vmul.f32 %v4215_v49, %v1730_v48  ;;  %v4806_v58 = vadd.f32 %v3478_v56, %v1741_v54 }
 0xfa6   :  { %v1742_v57 = vmul.f32 %v1740_v44, %v1736_v50 }
 0xfa8   :  { %v4808_v59 = vadd.f32 %v3478_v56, %v1742_v57 }
 0xfaa   :  { %v1786_v61 = vpack.c.bf16 %v4808_v59, %v4806_v58 }
 0xfac   :  { %3927 = vmatmul.mubr.msk.bf16.vlgmr.msra.gmra.mxu0 %vm41_vm0, %v1786_v61  ;;  %3951 = vmatmul.mubr.msk.bf16.vlgmr.msra.gmra.mxu1 %vm41_vm0, %v1786_v61 }
 0xfad   :  { %3931 = vmatpush3.bf16.msra.mxu0 %v4148_v60  ;;  %3938 = vmatprep.mubr.msk.bf16.mxu0 %vm4287_vm1, %v4286_v10 }
 0xfae   :  { %3932 = vmatprep.subr.bf16.mxu0 %v4286_v10  ;;  %3962 = vmatprep.mubr.msk.bf16.mxu1 %vm4287_vm1, %v4286_v10 }
 0xfb1   :  { %3933 = vmatpush3.bf16.msra.mxu0 %v4149_v23 }
 0xfb2   :  { %3934 = vmatprep.subr.bf16.mxu0 %v4286_v10 }
 0xfb5   :  { %3935 = vmatpush3.bf16.msra.mxu0 %v4150_v41 }
 0xfb6   :  { %3936 = vmatprep.subr.bf16.mxu0 %v4286_v10 }
 0xfb9   :  { %3937 = vmatpush3.bf16.msra.mxu0 %v4151_v0 }
 0xfba   :  { %3954 = vmatprep.subr.bf16.mxu0 %v4286_v10 }
 0xfbc   :  { %3939 = vmatmul.mubr.msk.bf16.vlgmr.msra.gmra.mxu0 %vm41_vm0, %v1786_v61 }
 0xfbd   :  { %3956 = vmatprep.mubr.msk.bf16.mxu0 %vm4287_vm1, %v4286_v10 }
0x106c   :  { %v1852_v1 = vpop.f32.mrf.mxu0  ;;  %v1994_v27 = vpop.f32.mrf.mxu1 }
0x106d   :  { %v1995_v19 = vadd.f32 %v1994_v27, %v1935_v53  ;;  %v1853_v25 = vadd.f32 %v1852_v1, %v1790_v9 }
0x106e   :  { %v3928_v28 = vpop.f32.mrf.mxu0  ;;  %v3952_v62 = vpop.f32.mrf.mxu1 }
0x106f   :  { %v4858_v8 = vpack.c.bf16 %v1995_v19, %v1995_v19  ;;  %v4862_v31 = vpack.c.bf16 %v1853_v25, %v1853_v25 }
0x1070   :  { %v1855_v22 = vpop.f32.mrf.mxu0  ;;  %v1997_v3 = vpop.f32.mrf.mxu1 }
0x1071   :  { %v1998_v29 = vadd.f32 %v1997_v3, %v1935_v53  ;;  %v1856_v32 = vadd.f32 %v1855_v22, %v1790_v9  ;;  %v2123_v34 = vsel %vm475_vm3, %v4858_v8, 0 }
0x1072   :  { %v3929_v7 = vpop.f32.mrf.mxu0  ;;  %v3953_v5 = vpop.f32.mrf.mxu1 }
0x1073   :  { %v4865_v33 = vpack.c.bf16 %v1998_v29, %v1998_v29  ;;  %v4873_v35 = vpack.c.bf16 %v1856_v32, %v1856_v32 }
0x1075   :  { %v2169_v36 = vsel %vm475_vm3, %v4865_v33, 0 }
0x107c   :  { %v1923_v17 = vpop.f32.mrf.mxu0 }
0x107d   :  { %v1924_v14 = vadd.f32 %v1923_v17, %v1864_v12 }
0x107e   :  { %v3940_v15 = vpop.f32.mrf.mxu0 }
0x107f   :  { %v4851_v16 = vpack.c.bf16 %v1924_v14, %v1924_v14 }
0x1080   :  { %v1926_v18 = vpop.f32.mrf.mxu0 }
0x1081   :  { %v1927_v20 = vadd.f32 %v1926_v18, %v1864_v12  ;;  %v2007_v21 = vsel %vm354_vm2, %v4851_v16, 0 }
0x1082   :  { %v3941_v52 = vpop.f32.mrf.mxu0  ;;  %3955 = vmatpush3.bf16.xpose.msra.mxu0 %v2007_v21 }
0x1083   :  { %v4855_v26 = vpack.c.bf16 %v1927_v20, %v1927_v20  ;;  %3966 = vmatprep.subr.bf16.mxu0 %v4286_v10 }
0x1085   :  { %v2053_v55 = vsel %vm354_vm2, %v4855_v26, 0 }
0x1086   :  { %3961 = vmatpush3.bf16.xpose.msra.mxu1 %v2053_v55 }
0x1087   :  { %3972 = vmatprep.subr.bf16.mxu1 %v4286_v10 }
0x1089   :  { %3957 = vmatmul.mubr.msk.bf16.vlgmr.msra.gmra.mxu0 %vm354_vm2, %v4862_v31 }
0x108a   :  { %3967 = vmatpush3.bf16.msra.mxu0 %v2123_v34  ;;  %3968 = vmatprep.mubr.msk.bf16.mxu0 %vm4287_vm1, %v4286_v10 }
0x108b   :  { %3978 = vmatprep.subr.bf16.mxu0 %v4286_v10 }
0x108d   :  { %3963 = vmatmul.mubr.msk.bf16.vlgmr.msra.gmra.mxu1 %vm354_vm2, %v4873_v35 }
0x108e   :  { %3973 = vmatpush3.bf16.msra.mxu1 %v2169_v36  ;;  %3974 = vmatprep.mubr.msk.bf16.mxu1 %vm4287_vm1, %v4286_v10 }
0x108f   :  { %3984 = vmatprep.subr.bf16.mxu1 %v4286_v10 }
0x1149   :  { %v2043_v37 = vpop.f32.mrf.mxu0 }
0x114a   :  { %v2044_v38 = vadd.f32 %v4886_v24, %v2043_v37 }
0x114b   :  { %v3958_v39 = vpop.f32.mrf.mxu0 }
0x114c   :  { %v2095_v40 = vsel %vm447_vm4, %v2044_v38, -inf }
0x114d   :  { %v2089_v42 = vpop.f32.mrf.mxu1  ;;  %2096 = vmax.xlane.f32.xlu0 %v2095_v40  ;;  %v2046_v45 = vpop.f32.mrf.mxu0 }
0x114e   :  { %v2090_v13 = vadd.f32 %v4893_v46, %v2089_v42 }
0x114f   :  { %v3959_v43 = vpop.f32.mrf.mxu0  ;;  %v3964_v47 = vpop.f32.mrf.mxu1 }
0x1150   :  { %v2098_v44 = vsel %vm447_vm4, %v2090_v13, -inf }
0x1151   :  { %2099 = vmax.xlane.f32.xlu1 %v2098_v44  ;;  %v2092_v48 = vpop.f32.mrf.mxu1 }
0x1153   :  { %v3965_v49 = vpop.f32.mrf.mxu1 }
0x1162   :  { %2268 = vrot.lane.b32.xlu1 %v4855_v26, %s4288_s23 }
0x11d6   :  { %v2097_v50 = vpop.xlane.xlu0 %2096 }
0x11d7   :  { %v2101_v54 = vsub.f32 %v2044_v38, %v2097_v50 }
0x11d9   :  { %v2103_v56 = vmul.f32 1.442695, %v2101_v54 }
0x11da   :  { %v2100_v57 = vpop.xlane.xlu1 %2099 }
0x11db   :  { %4216 = vpow2.f32 %v2103_v56  ;;  %v2102_v60 = vsub.f32 %v2090_v13, %v2100_v57 }
0x11dd   :  { %v2105_v61 = vmul.f32 1.442695, %v2102_v60 }
0x11de   :  { %v2269_v27 = vpop.permute.xlu1 %2268 }
0x11df   :  { %4218 = vpow2.f32 %v2105_v61  ;;  %v2274_v15 = vsel %vm354_vm2, %v2269_v27, 0 }
0x11e8   :  { %v4217_v23 = vpop.eup %4216 }
0x11e9   :  { %v2107_v41 = vsel %vm447_vm4, %v4217_v23, 0.0 }
0x11ea   :  { %2108 = vadd.xlane.f32.xlu0 %v2107_v41 }
0x11ec   :  { %v4219_v0 = vpop.eup %4218 }
0x11ed   :  { %v2110_v1 = vsel %vm447_vm4, %v4219_v0, 0.0 }
0x11ee   :  { %2111 = vadd.xlane.f32.xlu1 %v2110_v1 }
0x11ff   :  { %2213 = vrot.lane.b32.xlu1 %v4862_v31, %s4288_s23 }
0x1200   :  { %2216 = vrot.lane.b32.xlu0 %v4851_v16, %s4288_s23 }
0x1203   :  { %2265 = vrot.lane.b32.xlu1 %v4873_v35, %s4288_s23 }
0x1273   :  { %v2109_v28 = vpop.xlane.xlu0 %2108 }
0x1274   :  { %4220 = vrcp.f32 %v2109_v28 }
0x1277   :  { %v2112_v62 = vpop.xlane.xlu1 %2111  ;;  %v2217_v7 = vpop.permute.xlu0 %2216 }
0x1278   :  { %4222 = vrcp.f32 %v2112_v62  ;;  %v2222_v17 = vsel %vm354_vm2, %v2217_v7, 0 }
0x127b   :  { %v2214_v9 = vpop.permute.xlu1 %2213 }
0x127f   :  { %v2266_v18 = vpop.permute.xlu1 %2265 }
0x1281   :  { %v4221_v22 = vpop.eup %4220 }
0x1282   :  { %v2115_v3 = vmul.f32 %v4221_v22, %v4217_v23 }
0x1284   :  { %v2117_v5 = vpack.c.bf16 %v2115_v3, %v2115_v3 }
0x1285   :  { %v4223_v12 = vpop.eup %4222 }
0x1286   :  { %3969 = vmatmul.mubr.msk.bf16.vlgmr.msra.gmra.mxu0 %vm447_vm4, %v2117_v5  ;;  %v2116_v53 = vmul.f32 %v4223_v12, %v4219_v0 }
0x1287   :  { %3979 = vmatpush3.bf16.xpose.msra.mxu0 %v2222_v17  ;;  %3980 = vmatprep.mubr.msk.bf16.mxu0 %vm4287_vm1, %v4286_v10 }
0x1288   :  { %v2118_v14 = vpack.c.bf16 %v2116_v53, %v2116_v53  ;;  %3990 = vmatprep.subr.bf16.mxu0 %v4286_v10 }
0x128a   :  { %3975 = vmatmul.mubr.msk.bf16.vlgmr.msra.gmra.mxu1 %vm447_vm4, %v2118_v14  ;;  %v4152_v14 = vld [vmem:[%s5161_s6 + $0x20] sm:$0xff]  }
0x128b   :  { %3985 = vmatpush3.bf16.xpose.msra.mxu1 %v2274_v15  ;;  %3986 = vmatprep.mubr.msk.bf16.mxu1 %vm4287_vm1, %v4286_v10 }
0x128c   :  { %3996 = vmatprep.subr.bf16.mxu1 %v4286_v10 }
0x128e   :  { %3981 = vmatmul.mubr.msk.bf16.vlgmr.msra.gmra.mxu0 %vm354_vm2, %v2214_v9 }
0x128f   :  { %3992 = vmatprep.mubr.msk.bf16.mxu0 %vm4287_vm1, %v4286_v10 }
0x1292   :  { %3987 = vmatmul.mubr.msk.bf16.vlgmr.msra.gmra.mxu1 %vm354_vm2, %v2266_v18 }
0x1293   :  { %3998 = vmatprep.mubr.msk.bf16.mxu1 %vm4287_vm1, %v4286_v10 }
0x1346   :  { %v4923_v19 = vpop.f32.mrf.mxu0 }
0x1348   :  { %v3970_v20 = vpop.f32.mrf.mxu0 }
0x134a   :  { %v2162_v21 = vpop.f32.mrf.mxu0  ;;  %v4925_v52 = vpop.f32.mrf.mxu1 }
0x134b   :  { %v2211_v25 = vpack.c.bf16 %v4925_v52, %v4923_v19 }
0x134c   :  { %v3971_v29 = vpop.f32.mrf.mxu0  ;;  %v3976_v55 = vpop.f32.mrf.mxu1 }
0x134d   :  { %v4153_v29 = vld [vmem:[%s5161_s6 + $0x28] sm:$0xff]  }
0x134e   :  { %v2208_v32 = vpop.f32.mrf.mxu1  ;;  %v2258_v34 = vpop.f32.mrf.mxu0 }
0x134f   :  { %v2259_v36 = vadd.f32 %v4886_v24, %v2258_v34 }
0x1350   :  { %v3977_v37 = vpop.f32.mrf.mxu1  ;;  %v3982_v38 = vpop.f32.mrf.mxu0 }
0x1351   :  { %v2316_v39 = vsel %vm447_vm4, %v2259_v36, -inf }
0x1352   :  { %v2310_v40 = vpop.f32.mrf.mxu1  ;;  %2317 = vmax.xlane.f32.xlu0 %v2316_v39  ;;  %v2261_v42 = vpop.f32.mrf.mxu0 }
0x1353   :  { %v2311_v45 = vadd.f32 %v4893_v46, %v2310_v40 }
0x1354   :  { %v3983_v13 = vpop.f32.mrf.mxu0  ;;  %v3988_v43 = vpop.f32.mrf.mxu1 }
0x1355   :  { %v2319_v47 = vsel %vm447_vm4, %v2311_v45, -inf }
0x1356   :  { %2320 = vmax.xlane.f32.xlu1 %v2319_v47  ;;  %v2313_v44 = vpop.f32.mrf.mxu1 }
0x1358   :  { %v3989_v48 = vpop.f32.mrf.mxu1 }
0x1367   :  { %2390 = vrot.lane.b32.xlu1 %v4865_v33, %s4288_s23 }
0x136b   :  { %2541 = vrot.lane.b32.xlu1 %v4851_v16, %s4289_s24 }
0x136f   :  { %2591 = vrot.lane.b32.xlu1 %v4855_v26, %s4289_s24 }
0x1373   :  { %2589 = vrot.lane.b32.xlu1 %v4873_v35, %s4289_s24 }
0x13db   :  { %v2318_v49 = vpop.xlane.xlu0 %2317 }
0x13dc   :  { %v2322_v50 = vsub.f32 %v2259_v36, %v2318_v49 }
0x13de   :  { %v2324_v54 = vmul.f32 1.442695, %v2322_v50 }
0x13df   :  { %v2321_v56 = vpop.xlane.xlu1 %2320 }
0x13e0   :  { %4224 = vpow2.f32 %v2324_v54  ;;  %v2323_v57 = vsub.f32 %v2311_v45, %v2321_v56 }
0x13e2   :  { %v2326_v60 = vmul.f32 1.442695, %v2323_v57 }
0x13e3   :  { %v2391_v61 = vpop.permute.xlu1 %2390 }
0x13e4   :  { %4226 = vpow2.f32 %v2326_v60  ;;  %v2396_v23 = vsel %vm475_vm3, %v2391_v61, 0 }
0x13e5   :  { %3997 = vmatpush3.bf16.msra.mxu1 %v2396_v23 }
0x13e6   :  { %4008 = vmatprep.subr.bf16.mxu1 %v4286_v10 }
0x13e7   :  { %v2542_v9 = vpop.permute.xlu1 %2541 }
0x13e8   :  { %v2547_v37 = vsel %vm354_vm2, %v2542_v9, 0 }
0x13eb   :  { %v2592_v18 = vpop.permute.xlu1 %2591 }
0x13ec   :  { %v2597_v20 = vsel %vm354_vm2, %v2592_v18, 0 }
0x13ed   :  { %v4225_v41 = vpop.eup %4224 }
0x13ee   :  { %v2328_v0 = vsel %vm447_vm4, %v4225_v41, 0.0 }
0x13ef   :  { %2329 = vadd.xlane.f32.xlu0 %v2328_v0  ;;  %v2590_v21 = vpop.permute.xlu1 %2589 }
0x13f1   :  { %v4227_v1 = vpop.eup %4226 }
0x13f2   :  { %v2331_v27 = vsel %vm447_vm4, %v4227_v1, 0.0 }
0x13f3   :  { %2332 = vadd.xlane.f32.xlu0 %v2331_v27 }
0x1409   :  { %2341 = vrot.lane.b32.xlu0 %v4858_v8, %s4288_s23 }
0x140d   :  { %2539 = vrot.lane.b32.xlu0 %v4862_v31, %s4289_s24 }
0x1478   :  { %v2330_v28 = vpop.xlane.xlu0 %2329 }
0x1479   :  { %4228 = vrcp.f32 %v2330_v28 }
0x147c   :  { %v2333_v62 = vpop.xlane.xlu0 %2332 }
0x147d   :  { %4230 = vrcp.f32 %v2333_v62 }
0x1480   :  { %v2342_v22 = vpop.permute.xlu0 %2341 }
0x1481   :  { %v2347_v3 = vsel %vm475_vm3, %v2342_v22, 0 }
0x1482   :  { %3991 = vmatpush3.bf16.msra.mxu0 %v2347_v3 }
0x1483   :  { %4002 = vmatprep.subr.bf16.mxu0 %v4286_v10 }
0x1484   :  { %v2540_v42 = vpop.permute.xlu0 %2539 }
0x1486   :  { %v4229_v7 = vpop.eup %4228 }
0x1487   :  { %v2336_v5 = vmul.f32 %v4229_v7, %v4225_v41 }
0x1489   :  { %v2338_v12 = vpack.c.bf16 %v2336_v5, %v2336_v5 }
0x148a   :  { %v4231_v17 = vpop.eup %4230 }
0x148b   :  { %3993 = vmatmul.mubr.msk.bf16.vlgmr.msra.gmra.mxu0 %vm447_vm4, %v2338_v12  ;;  %v2337_v53 = vmul.f32 %v4231_v17, %v4227_v1 }
0x148c   :  { %4004 = vmatprep.mubr.msk.bf16.mxu0 %vm4287_vm1, %v4286_v10  ;;  %4003 = vmatpush3.bf16.msra.mxu0 %v4153_v29 }
0x148d   :  { %v2339_v15 = vpack.c.bf16 %v2337_v53, %v2337_v53  ;;  %4014 = vmatprep.subr.bf16.mxu0 %v4286_v10 }
0x148f   :  { %3999 = vmatmul.mubr.msk.bf16.vlgmr.msra.gmra.mxu1 %vm447_vm4, %v2339_v15 }
0x1490   :  { %4009 = vmatpush3.bf16.msra.mxu1 %v4152_v14  ;;  %4010 = vmatprep.mubr.msk.bf16.mxu1 %vm4287_vm1, %v4286_v10 }
0x1491   :  { %4020 = vmatprep.subr.bf16.mxu1 %v4286_v10 }
0x1497   :  { %4011 = vmatmul.mubr.msk.bf16.vlgmr.msra.gmra.mxu1 %vm354_vm2, %v2211_v25 }
0x1498   :  { %4021 = vmatpush3.bf16.xpose.msra.mxu1 %v2597_v20  ;;  %4022 = vmatprep.mubr.msk.bf16.mxu1 %vm4287_vm1, %v4286_v10 }
0x1499   :  { %4032 = vmatprep.subr.bf16.mxu1 %v4286_v10 }
0x149f   :  { %4023 = vmatmul.mubr.msk.bf16.vlgmr.msra.gmra.mxu1 %vm354_vm2, %v2590_v21 }
0x14a0   :  { %4034 = vmatprep.mubr.msk.bf16.mxu1 %vm4287_vm1, %v4286_v10 }
0x154b   :  { %v2383_v19 = vpop.f32.mrf.mxu0 }
0x154d   :  { %v3994_v52 = vpop.f32.mrf.mxu0 }
0x154f   :  { %v2386_v25 = vpop.f32.mrf.mxu0  ;;  %v2432_v55 = vpop.f32.mrf.mxu1 }
0x1550   :  { %v2438_v32 = vpack.c.bf16 %v2432_v55, %v2383_v19 }
0x1551   :  { %v3995_v34 = vpop.f32.mrf.mxu0  ;;  %v4000_v36 = vpop.f32.mrf.mxu1 }
0x1552   :  { %4005 = vmatmul.mubr.msk.bf16.vlgmr.msra.gmra.mxu0 %vm354_vm2, %v2438_v32 }
0x1553   :  { %4015 = vmatpush3.bf16.xpose.msra.mxu0 %v2547_v37  ;;  %v2435_v38 = vpop.f32.mrf.mxu1  ;;  %4016 = vmatprep.mubr.msk.bf16.mxu0 %vm4287_vm1, %v4286_v10 }
0x1554   :  { %4026 = vmatprep.subr.bf16.mxu0 %v4286_v10 }
0x1555   :  { %v4001_v39 = vpop.f32.mrf.mxu1 }
0x1557   :  { %v4981_v40 = vpop.f32.mrf.mxu1 }
0x1559   :  { %v4012_v45 = vpop.f32.mrf.mxu1 }
0x155a   :  { %4017 = vmatmul.mubr.msk.bf16.vlgmr.msra.gmra.mxu0 %vm354_vm2, %v2540_v42  ;;  %v4154_v42 = vld [vmem:[%s5161_s6 + $0x30] sm:$0xff]  }
0x155b   :  { %v4984_v13 = vpop.f32.mrf.mxu1  ;;  %4028 = vmatprep.mubr.msk.bf16.mxu0 %vm4287_vm1, %v4286_v10 }
0x155d   :  { %v4013_v43 = vpop.f32.mrf.mxu1 }
0x155f   :  { %v2633_v47 = vpop.f32.mrf.mxu1 }
0x1560   :  { %v2634_v44 = vadd.f32 %v4893_v46, %v2633_v47 }
0x1561   :  { %v4024_v48 = vpop.f32.mrf.mxu1 }
0x1562   :  { %v2642_v49 = vsel %vm447_vm4, %v2634_v44, -inf }
0x1563   :  { %2643 = vmax.xlane.f32.xlu1 %v2642_v49  ;;  %v2636_v50 = vpop.f32.mrf.mxu1 }
0x1565   :  { %v4025_v54 = vpop.f32.mrf.mxu1 }
0x1574   :  { %2711 = vrot.lane.b32.xlu1 %v4865_v33, %s4289_s24 }
0x1578   :  { %2814 = vrot.lane.b32.xlu1 %v4851_v16, %s4290_s29 }
0x157c   :  { %2864 = vrot.lane.b32.xlu1 %v4855_v26, %s4290_s29 }
0x1580   :  { %2862 = vrot.lane.b32.xlu1 %v4873_v35, %s4290_s29 }
0x15ec   :  { %v2644_v56 = vpop.xlane.xlu1 %2643 }
0x15ed   :  { %v2646_v61 = vsub.f32 %v2634_v44, %v2644_v56 }
0x15ef   :  { %v2649_v23 = vmul.f32 1.442695, %v2646_v61 }
0x15f0   :  { %v2712_v57 = vpop.permute.xlu1 %2711 }
0x15f1   :  { %v2717_v60 = vsel %vm475_vm3, %v2712_v57, 0  ;;  %4232 = vpow2.f32 %v2649_v23 }
0x15f2   :  { %4033 = vmatpush3.bf16.msra.mxu1 %v2717_v60 }
0x15f3   :  { %4044 = vmatprep.subr.bf16.mxu1 %v4286_v10 }
0x15f4   :  { %v2815_v20 = vpop.permute.xlu1 %2814 }
0x15f5   :  { %v2820_v29 = vsel %vm354_vm2, %v2815_v20, 0 }
0x15f8   :  { %v2865_v50 = vpop.permute.xlu1 %2864 }
0x15f9   :  { %v2870_v60 = vsel %vm354_vm2, %v2865_v50, 0 }
0x15fc   :  { %v2863_v23 = vpop.permute.xlu1 %2862 }
0x15fe   :  { %v4233_v62 = vpop.eup %4232 }
0x15ff   :  { %v2654_v7 = vsel %vm447_vm4, %v4233_v62, 0.0 }
0x1612   :  { %v5000_v41 = vpop.f32.mrf.mxu0 }
0x1614   :  { %v4006_v0 = vpop.f32.mrf.mxu0 }
0x1616   :  { %v5002_v16 = vpop.f32.mrf.mxu0 }
0x1618   :  { %v4007_v1 = vpop.f32.mrf.mxu0 }
0x161a   :  { %v2583_v26 = vpop.f32.mrf.mxu0 }
0x161b   :  { %v2584_v27 = vadd.f32 %v4886_v24, %v2583_v26 }
0x161c   :  { %v4018_v35 = vpop.f32.mrf.mxu0 }
0x161d   :  { %v2639_v28 = vsel %vm447_vm4, %v2584_v27, -inf }
0x161e   :  { %2640 = vmax.xlane.f32.xlu0 %v2639_v28  ;;  %v2586_v22 = vpop.f32.mrf.mxu0  ;;  %v2533_v28 = vadd.f32 %v4981_v40, %v5000_v41 }
0x1620   :  { %v4019_v3 = vpop.f32.mrf.mxu0 }
0x1622   :  { %2655 = vadd.xlane.f32.xlu0 %v2654_v7  ;;  %v2536_v7 = vadd.f32 %v4984_v13, %v5002_v16 }
0x16a7   :  { %v2641_v5 = vpop.xlane.xlu0 %2640 }
0x16a8   :  { %v2645_v12 = vsub.f32 %v2584_v27, %v2641_v5 }
0x16aa   :  { %v2647_v17 = vmul.f32 1.442695, %v2645_v12 }
0x16ab   :  { %v2656_v53 = vpop.xlane.xlu0 %2655 }
0x16ac   :  { %4234 = vpow2.f32 %v2647_v17 }
0x16ad   :  { %4236 = vrcp.f32 %v2656_v53 }
0x16b9   :  { %v4235_v14 = vpop.eup %4234 }
0x16ba   :  { %v4237_v15 = vpop.eup %4236  ;;  %v2651_v9 = vsel %vm447_vm4, %v4235_v14, 0.0 }
0x16bb   :  { %2652 = vadd.xlane.f32.xlu0 %v2651_v9  ;;  %v2660_v18 = vmul.f32 %v4237_v15, %v4233_v62 }
0x16bd   :  { %v2662_v21 = vpack.c.bf16 %v2660_v18, %v2660_v18 }
0x16bf   :  { %4035 = vmatmul.mubr.msk.bf16.vlgmr.msra.gmra.mxu1 %vm447_vm4, %v2662_v21 }
0x16c0   :  { %4045 = vmatpush3.bf16.xpose.msra.mxu1 %v2820_v29  ;;  %4046 = vmatprep.mubr.msk.bf16.mxu1 %vm4287_vm1, %v4286_v10 }
0x16c1   :  { %4056 = vmatprep.subr.bf16.mxu1 %v4286_v10 }
0x16d1   :  { %2663 = vrot.lane.b32.xlu0 %v4858_v8, %s4289_s24 }
0x16d5   :  { %2812 = vrot.lane.b32.xlu0 %v4862_v31, %s4290_s29 }
0x1744   :  { %v2653_v19 = vpop.xlane.xlu0 %2652 }
0x1745   :  { %4238 = vrcp.f32 %v2653_v19 }
0x1748   :  { %v2664_v52 = vpop.permute.xlu0 %2663 }
0x1749   :  { %v2669_v25 = vsel %vm475_vm3, %v2664_v52, 0 }
0x174a   :  { %4027 = vmatpush3.bf16.msra.mxu0 %v2669_v25 }
0x174b   :  { %4038 = vmatprep.subr.bf16.mxu0 %v4286_v10 }
0x174c   :  { %v2813_v55 = vpop.permute.xlu0 %2812 }
0x174d   :  { %4047 = vmatmul.mubr.msk.bf16.vlgmr.msra.gmra.mxu1 %vm354_vm2, %v2813_v55 }
0x174e   :  { %4058 = vmatprep.mubr.msk.bf16.mxu1 %vm4287_vm1, %v4286_v10 }
0x1752   :  { %v4239_v32 = vpop.eup %4238 }
0x1753   :  { %v2659_v34 = vmul.f32 %v4239_v32, %v4235_v14 }
0x1755   :  { %v2661_v36 = vpack.c.bf16 %v2659_v34, %v2659_v34 }
0x1757   :  { %4029 = vmatmul.mubr.msk.bf16.vlgmr.msra.gmra.mxu0 %vm447_vm4, %v2661_v36 }
0x1758   :  { %4040 = vmatprep.mubr.msk.bf16.mxu0 %vm4287_vm1, %v4286_v10  ;;  %4039 = vmatpush3.bf16.msra.mxu0 %v4154_v42 }
0x1759   :  { %4050 = vmatprep.subr.bf16.mxu0 %v4286_v10 }
0x177f   :  { %v2753_v31 = vpop.f32.mrf.mxu1 }
0x1781   :  { %v4036_v37 = vpop.f32.mrf.mxu1 }
0x1782   :  { %v4155_v37 = vld [vmem:[%s5161_s6 + $0x38] sm:$0xff]  }
0x1783   :  { %v2756_v38 = vpop.f32.mrf.mxu1 }
0x1785   :  { %v4037_v39 = vpop.f32.mrf.mxu1 }
0x180d   :  { %v2856_v45 = vpop.f32.mrf.mxu1 }
0x180e   :  { %v2857_v43 = vadd.f32 %v4886_v24, %v2856_v45 }
0x180f   :  { %v4048_v47 = vpop.f32.mrf.mxu1 }
0x1810   :  { %v2912_v44 = vsel %vm447_vm4, %v2857_v43, -inf }
0x1811   :  { %2913 = vmax.xlane.f32.xlu0 %v2912_v44  ;;  %v2859_v48 = vpop.f32.mrf.mxu1 }
0x1813   :  { %v4049_v49 = vpop.f32.mrf.mxu1 }
0x1817   :  { %v2705_v54 = vpop.f32.mrf.mxu0 }
0x1818   :  { %v2759_v56 = vpack.c.bf16 %v2753_v31, %v2705_v54 }
0x1819   :  { %v4030_v57 = vpop.f32.mrf.mxu0 }
0x181a   :  { %4041 = vmatmul.mubr.msk.bf16.vlgmr.msra.gmra.mxu0 %vm354_vm2, %v2759_v56  ;;  %v3090_v56 = vrot.slane %v4840_v11, %v1443_v30 }
0x181b   :  { %4051 = vmatpush3.bf16.xpose.msra.mxu0 %v2870_v60  ;;  %v2708_v61 = vpop.f32.mrf.mxu0  ;;  %4052 = vmatprep.mubr.msk.bf16.mxu0 %vm4287_vm1, %v4286_v10 }
0x181c   :  { %4062 = vmatprep.subr.bf16.mxu0 %v4286_v10 }
0x181d   :  { %v4031_v24 = vpop.f32.mrf.mxu0 }
0x1822   :  { %4053 = vmatmul.mubr.msk.bf16.vlgmr.msra.gmra.mxu0 %vm354_vm2, %v2863_v23 }
0x1823   :  { %4064 = vmatprep.mubr.msk.bf16.mxu0 %vm4287_vm1, %v4286_v10 }
0x189a   :  { %v2914_v0 = vpop.xlane.xlu0 %2913 }
0x189b   :  { %v2918_v1 = vsub.f32 %v2857_v43, %v2914_v0 }
0x189d   :  { %v2920_v26 = vmul.f32 1.442695, %v2918_v1 }
0x189f   :  { %4240 = vpow2.f32 %v2920_v26 }
0x18ac   :  { %v4241_v27 = vpop.eup %4240 }
0x18ad   :  { %v2924_v35 = vsel %vm447_vm4, %v4241_v27, 0.0 }
0x18ae   :  { %2925 = vadd.xlane.f32.xlu0 %v2924_v35 }
0x18da   :  { %v2803_v62 = vpop.f32.mrf.mxu0 }
0x18db   :  { %v2810_v22 = vadd.f32 %v2803_v62, %v2533_v28 }
0x18dc   :  { %v4042_v3 = vpop.f32.mrf.mxu0 }
0x18dd   :  { %v4158_v3 = vld [vmem:[%s5162_s7 + $0x28] sm:$0xff]  }
0x18de   :  { %v2806_v5 = vpop.f32.mrf.mxu0 }
0x18df   :  { %v2811_v12 = vadd.f32 %v2806_v5, %v2536_v7  ;;  %v4159_v7 = vld [vmem:[%s5162_s7 + $0x20] sm:$0xff]  }
0x18e0   :  { %v4043_v17 = vpop.f32.mrf.mxu0 }
0x18e2   :  { %v2906_v53 = vpop.f32.mrf.mxu0 }
0x18e3   :  { %v2907_v14 = vadd.f32 %v4893_v46, %v2906_v53 }
0x18e4   :  { %v4054_v15 = vpop.f32.mrf.mxu0 }
0x18e5   :  { %v2915_v9 = vsel %vm447_vm4, %v2907_v14, -inf }
0x18e6   :  { %2916 = vmax.xlane.f32.xlu1 %v2915_v9  ;;  %v2909_v18 = vpop.f32.mrf.mxu0 }
0x18e8   :  { %v4055_v20 = vpop.f32.mrf.mxu0 }
0x18f7   :  { %2984 = vrot.lane.b32.xlu1 %v4865_v33, %s4290_s29 }
0x1937   :  { %v2926_v19 = vpop.xlane.xlu0 %2925 }
0x196f   :  { %v2917_v40 = vpop.xlane.xlu1 %2916 }
0x1970   :  { %v2919_v41 = vsub.f32 %v2907_v14, %v2917_v40 }
0x1972   :  { %v2922_v21 = vmul.f32 1.442695, %v2919_v41 }
0x1973   :  { %v2985_v29 = vpop.permute.xlu1 %2984 }
0x1974   :  { %4242 = vpow2.f32 %v2922_v21  ;;  %v2990_v13 = vsel %vm475_vm3, %v2985_v29, 0 }
0x1975   :  { %4063 = vmatpush3.bf16.msra.mxu0 %v2990_v13  ;;  %4244 = vrcp.f32 %v2926_v19 }
0x1976   :  { %4074 = vmatprep.subr.bf16.mxu0 %v4286_v10 }
0x1981   :  { %v4243_v46 = vpop.eup %4242 }
0x1982   :  { %v2927_v16 = vsel %vm447_vm4, %v4243_v46, 0.0  ;;  %v4245_v33 = vpop.eup %4244 }
0x1983   :  { %2928 = vadd.xlane.f32.xlu0 %v2927_v16  ;;  %v2932_v25 = vmul.f32 %v4245_v33, %v4241_v27  ;;  %v3128_v33 = vrot.slane %v4840_v11, %v1481_v2  ;;  %v4160_v2 = vld [vmem:[%s5163_s8 + $0x78] sm:$0xff]  }
0x1985   :  { %v2934_v34 = vpack.c.bf16 %v2932_v25, %v2932_v25 }
0x1999   :  { %2936 = vrot.lane.b32.xlu0 %v4858_v8, %s4290_s29 }
0x1a0c   :  { %v2929_v52 = vpop.xlane.xlu0 %2928 }
0x1a0d   :  { %4246 = vrcp.f32 %v2929_v52 }
0x1a10   :  { %v2937_v55 = vpop.permute.xlu0 %2936 }
0x1a11   :  { %v2942_v32 = vsel %vm475_vm3, %v2937_v55, 0 }
0x1a12   :  { %4057 = vmatpush3.bf16.msra.mxu1 %v2942_v32 }
0x1a13   :  { %4068 = vmatprep.subr.bf16.mxu1 %v4286_v10 }
0x1a15   :  { %4059 = vmatmul.mubr.msk.bf16.vlgmr.msra.gmra.mxu1 %vm447_vm4, %v2934_v34 }
0x1a16   :  { %4070 = vmatprep.mubr.msk.bf16.mxu1 %vm4287_vm1, %v4286_v10  ;;  %4069 = vmatpush3.bf16.msra.mxu1 %v4155_v37 }
0x1a17   :  { %4086 = vmatprep.subr.bf16.mxu1 %v4286_v10 }
0x1a1a   :  { %v4247_v36 = vpop.eup %4246 }
0x1a1b   :  { %v2933_v8 = vmul.f32 %v4247_v36, %v4243_v46 }
0x1a1d   :  { %v2935_v31 = vpack.c.bf16 %v2933_v8, %v2933_v8  ;;  %v3134_v8 = vrot.slane %v4840_v11, %v1487_v4  ;;  %v4162_v4 = vld [vmem:[%s5163_s8 + $0x68] sm:$0xff]  }
0x1a1f   :  { %4065 = vmatmul.mubr.msk.bf16.vlgmr.msra.gmra.mxu0 %vm447_vm4, %v2935_v31 }
0x1a20   :  { %4082 = vmatprep.mubr.msk.bf16.mxu0 %vm4287_vm1, %v4286_v10 }
0x1ad5   :  { %v2978_v38 = vpop.f32.mrf.mxu1 }
0x1ad7   :  { %v4060_v39 = vpop.f32.mrf.mxu1 }
0x1ad9   :  { %v2981_v42 = vpop.f32.mrf.mxu1 }
0x1ada   :  { %v4161_v42 = vld [vmem:[%s5163_s8 + $0x70] sm:$0xff]  }
0x1adb   :  { %v4061_v45 = vpop.f32.mrf.mxu1 }
0x1adc   :  { %v4163_v45 = vld [vmem:[%s5163_s8 + $0x60] sm:$0xff]  }
0x1adf   :  { %v3026_v43 = vpop.f32.mrf.mxu0 }
0x1ae0   :  { %v3032_v47 = vpack.c.bf16 %v3026_v43, %v2978_v38  ;;  %v4164_v43 = vld [vmem:[%s5163_s8 + $0x58] sm:$0xff]  }
0x1ae1   :  { %v4066_v44 = vpop.f32.mrf.mxu0 }
0x1ae2   :  { %4071 = vmatmul.mubr.msk.bf16.vlgmr.msra.gmra.mxu1 %vm354_vm2, %v3032_v47  ;;  %v4165_v47 = vld [vmem:[%s5163_s8 + $0x50] sm:$0xff]   ;;  %v4166_v44 = vld [vmem:[%s5163_s8 + $0x48] sm:$0xff]  }
0x1ae3   :  { %v3029_v48 = vpop.f32.mrf.mxu0  ;;  %4102 = vmatprep.mubr.msk.bf16.mxu1 %vm4287_vm1, %v4286_v10  ;;  %4087 = vmatpush3.bf16.msra.mxu1 %v4160_v2 }
0x1ae4   :  { %4088 = vmatprep.subr.bf16.mxu1 %v4286_v10  ;;  %v4167_v48 = vld [vmem:[%s5163_s8 + $0x40] sm:$0xff]  }
0x1ae5   :  { %v4067_v49 = vpop.f32.mrf.mxu0 }
0x1ae6   :  { %v3561_v49 = vld [vmem:[%s5160_s5 + $0x1] ss:$0 sm:$0xff] }
0x1ae7   :  { %4089 = vmatpush3.bf16.msra.mxu1 %v4161_v42 }
0x1ae8   :  { %4090 = vmatprep.subr.bf16.mxu1 %v4286_v10 }
0x1aeb   :  { %4091 = vmatpush3.bf16.msra.mxu1 %v4162_v4 }
0x1aec   :  { %4092 = vmatprep.subr.bf16.mxu1 %v4286_v10 }
0x1aef   :  { %4093 = vmatpush3.bf16.msra.mxu1 %v4163_v45 }
0x1af0   :  { %4094 = vmatprep.subr.bf16.mxu1 %v4286_v10 }
0x1af3   :  { %4095 = vmatpush3.bf16.msra.mxu1 %v4164_v43 }
0x1af4   :  { %4096 = vmatprep.subr.bf16.mxu1 %v4286_v10 }
0x1af7   :  { %4097 = vmatpush3.bf16.msra.mxu1 %v4165_v47 }
0x1af8   :  { %4098 = vmatprep.subr.bf16.mxu1 %v4286_v10 }
0x1afb   :  { %4099 = vmatpush3.bf16.msra.mxu1 %v4166_v44 }
0x1afc   :  { %4100 = vmatprep.subr.bf16.mxu1 %v4286_v10 }
0x1aff   :  { %4101 = vmatpush3.bf16.msra.mxu1 %v4167_v48  ;;  %v4263_v48 = vld [vmem:[%s5159_s4 + $0x10] sm:$0xff] }
0x1ba2   :  { %v3076_v50 = vpop.f32.mrf.mxu1 }
0x1ba3   :  { %v3083_v54 = vadd.f32 %v3076_v50, %v2810_v22  ;;  %v4156_v22 = vld [vmem:[%s5162_s7 + $0x38] sm:$0xff]  }
0x1ba4   :  { %v4072_v57 = vpop.f32.mrf.mxu1  ;;  %4075 = vmatpush3.bf16.msra.mxu0 %v4156_v22 }
0x1ba5   :  { %v3085_v60 = vadd.f32 %v3083_v54, %v4806_v58  ;;  %4076 = vmatprep.subr.bf16.mxu0 %v4286_v10 }
0x1ba6   :  { %v3079_v61 = vpop.f32.mrf.mxu1 }
0x1ba7   :  { %v3091_v24 = vadd.f32 %v3090_v56, %v3085_v60  ;;  %v3084_v23 = vadd.f32 %v3079_v61, %v2811_v12 }
0x1ba8   :  { %v4073_v0 = vpop.f32.mrf.mxu1 }
0x1ba9   :  { %v3086_v1 = vadd.f32 %v3084_v23, %v4808_v59  ;;  %v3093_v26 = vsel %vm41_vm0, %v3091_v24, 0.0  ;;  %v3101_v62 = vmul.f32 %v3091_v24, %v3091_v24  ;;  %v4157_v59 = vld [vmem:[%s5162_s7 + $0x30] sm:$0xff]  }
0x1baa   :  { %3094 = vadd.xlane.f32.xlu1 %v3093_v26  ;;  %4077 = vmatpush3.bf16.msra.mxu0 %v4157_v59 }
0x1bab   :  { %v3092_v27 = vadd.f32 %v3090_v56, %v3086_v1  ;;  %v3103_v58 = vsel %vm41_vm0, %v3101_v62, 0.0  ;;  %4078 = vmatprep.subr.bf16.mxu0 %v4286_v10 }
0x1bad   :  { %v3096_v35 = vsel %vm41_vm0, %v3092_v27, 0.0  ;;  %v3102_v28 = vmul.f32 %v3092_v27, %v3092_v27 }
0x1bae   :  { %3097 = vadd.xlane.f32.xlu0 %v3096_v35  ;;  %4079 = vmatpush3.bf16.msra.mxu0 %v4158_v3 }
0x1baf   :  { %v3106_v30 = vsel %vm41_vm0, %v3102_v28, 0.0  ;;  %4080 = vmatprep.subr.bf16.mxu0 %v4286_v10 }
0x1bb0   :  { %3107 = vadd.xlane.f32.xlu1 %v3106_v30 }
0x1bb2   :  { %3104 = vadd.xlane.f32.xlu0 %v3103_v58  ;;  %4081 = vmatpush3.bf16.msra.mxu0 %v4159_v7 }
0x1c33   :  { %v3095_v5 = vpop.xlane.xlu1 %3094 }
0x1c34   :  { %v3099_v17 = vmul.f32 0.015625, %v3095_v5 }
0x1c36   :  { %v3111_v20 = vmul.f32 %v3099_v17, %v3099_v17  ;;  %v3117_v25 = vsub.f32 %v3091_v24, %v3099_v17 }
0x1c37   :  { %v3098_v12 = vpop.xlane.xlu0 %3097 }
0x1c38   :  { %v3100_v53 = vmul.f32 0.015625, %v3098_v12 }
0x1c39   :  { %v3108_v14 = vpop.xlane.xlu1 %3107 }
0x1c3a   :  { %v3112_v15 = vmul.f32 %v3100_v53, %v3100_v53  ;;  %v3110_v9 = vmul.f32 0.015625, %v3108_v14  ;;  %v3118_v19 = vsub.f32 %v3092_v27, %v3100_v53  ;;  %v3262_v53 = vrot.slane %v4840_v11, %v1612_v63 }
0x1c3b   :  { %v3105_v18 = vpop.xlane.xlu0 %3104 }
0x1c3c   :  { %v3114_v40 = vsub.f32 %v3110_v9, %v3112_v15  ;;  %v3109_v41 = vmul.f32 0.015625, %v3105_v18 }
0x1c3e   :  { %v3116_v21 = vmax.f32 %v3114_v40, 0.0  ;;  %v3113_v29 = vsub.f32 %v3109_v41, %v3111_v20 }
0x1c40   :  { %v3120_v13 = vadd.f32 1e-12, %v3116_v21  ;;  %v3115_v46 = vmax.f32 %v3113_v29, 0.0 }
0x1c42   :  { %4248 = vrsqrt.f32 %v3120_v13  ;;  %v3119_v16 = vadd.f32 1e-12, %v3115_v46 }
0x1c44   :  { %4250 = vrsqrt.f32 %v3119_v16 }
0x1c4f   :  { %v4249_v52 = vpop.eup %4248 }
0x1c50   :  { %v3124_v55 = vmul.f32 %v4249_v52, %v3118_v19 }
0x1c51   :  { %v4251_v32 = vpop.eup %4250 }
0x1c52   :  { %v3123_v34 = vmul.f32 %v4251_v32, %v3117_v25  ;;  %v3130_v36 = vmul.f32 %v3128_v33, %v3124_v55 }
0x1c54   :  { %v3129_v31 = vmul.f32 %v3128_v33, %v3123_v34  ;;  %v5098_v38 = vadd.f32 %v3134_v8, %v3130_v36 }
0x1c56   :  { %v3135_v37 = vadd.f32 %v3134_v8, %v3129_v31 }
0x1c58   :  { %v3137_v39 = vpack.c.bf16 %v5098_v38, %v3135_v37 }
0x1c5a   :  { %4083 = vmatmul.mubr.msk.bf16.vlgmr.msra.gmra.mxu0 %vm41_vm0, %v3137_v39 }
0x1d1a   :  { %v3216_v50 = vpop.f32.mrf.mxu0 }
0x1d1b   :  { %v3217_v54 = vadd.f32 %v3561_v49, %v3216_v50 }
0x1d1c   :  { %v4084_v56 = vpop.f32.mrf.mxu0 }
0x1d1d   :  { %v3223_v57 = vmul.f32 %v3217_v54, %v3217_v54 }
0x1d1e   :  { %v3219_v60 = vpop.f32.mrf.mxu0 }
0x1d1f   :  { %v3225_v61 = vmul.f32 %v3223_v57, %v3217_v54  ;;  %v3220_v24 = vadd.f32 %v3561_v49, %v3219_v60  ;;  %v3389_v49 = vrot.slane %v4263_v48, %v1739_v6  ;;  %v3591_v60 = vld [vmem:[%s5159_s4 + $0x18] ss:$0 sm:$0xff] }
0x1d20   :  { %v4085_v23 = vpop.f32.mrf.mxu0 }
0x1d21   :  { %v3227_v0 = vmul.f32 0.044715, %v3225_v61  ;;  %v3224_v1 = vmul.f32 %v3220_v24, %v3220_v24 }
0x1d23   :  { %v3229_v10 = vadd.f32 %v3227_v0, %v3217_v54  ;;  %v3226_v26 = vmul.f32 %v3224_v1, %v3220_v24 }
0x1d25   :  { %v3231_v27 = vmul.f32 0.7978846, %v3229_v10  ;;  %v3228_v35 = vmul.f32 0.044715, %v3226_v26 }
0x1d27   :  { %4252 = vtanh.f32 %v3231_v27  ;;  %v3230_v28 = vadd.f32 %v3228_v35, %v3220_v24 }
0x1d29   :  { %v3232_v62 = vmul.f32 0.7978846, %v3230_v28 }
0x1d2b   :  { %4254 = vtanh.f32 %v3232_v62 }
0x1d34   :  { %v4253_v30 = vpop.eup %4252 }
0x1d35   :  { %v3235_v58 = vadd.f32 1.0, %v4253_v30 }
0x1d37   :  { %v3237_v59 = vmul.f32 0.5, %v3235_v58 }
0x1d38   :  { %v4255_v22 = vpop.eup %4254 }
0x1d39   :  { %v3236_v3 = vadd.f32 1.0, %v4255_v22  ;;  %v3239_v5 = vmul.f32 %v3237_v59, %v3217_v54 }
0x1d3b   :  { %v3238_v7 = vmul.f32 0.5, %v3236_v3 }
0x1d3d   :  { %v3240_v12 = vmul.f32 %v3238_v7, %v3220_v24 }
0x1d3f   :  { %v3241_v17 = vpack.c.bf16 %v3240_v12, %v3239_v5 }
0x1d41   :  { %4103 = vmatmul.mubr.bf16.vlgmr.msra.gmra.mxu1 %v3241_v17 }
0x1e01   :  { %v3345_v14 = vpop.f32.mrf.mxu1 }
0x1e02   :  { %v3346_v15 = vadd.f32 %v3345_v14, %v3262_v53 }
0x1e03   :  { %v4104_v9 = vpop.f32.mrf.mxu1 }
0x1e04   :  { %v3352_v18 = vadd.f32 %v3346_v15, %v3135_v37 }
0x1e05   :  { %v3348_v20 = vpop.f32.mrf.mxu1 }
0x1e06   :  { %v3349_v40 = vadd.f32 %v3348_v20, %v3262_v53  ;;  %v3354_v41 = vsel %vm41_vm0, %v3352_v18, 0.0  ;;  %v3362_v21 = vmul.f32 %v3352_v18, %v3352_v18 }
0x1e07   :  { %3355 = vadd.xlane.f32.xlu1 %v3354_v41  ;;  %v4105_v29 = vpop.f32.mrf.mxu1 }
0x1e08   :  { %v3353_v13 = vadd.f32 %v3349_v40, %v5098_v38  ;;  %v3364_v46 = vsel %vm41_vm0, %v3362_v21, 0.0 }
0x1e0a   :  { %v3357_v16 = vsel %vm41_vm0, %v3353_v13, 0.0  ;;  %v3363_v19 = vmul.f32 %v3353_v13, %v3353_v13 }
0x1e0b   :  { %3365 = vadd.xlane.f32.xlu1 %v3364_v46  ;;  %3358 = vadd.xlane.f32.xlu0 %v3357_v16 }
0x1e0c   :  { %v3367_v63 = vsel %vm41_vm0, %v3363_v19, 0.0 }
0x1e0f   :  { %3368 = vadd.xlane.f32.xlu0 %v3367_v63 }
0x1e90   :  { %v3356_v11 = vpop.xlane.xlu1 %3355 }
0x1e91   :  { %v3360_v33 = vmul.f32 0.015625, %v3356_v11 }
0x1e93   :  { %v3372_v55 = vmul.f32 %v3360_v33, %v3360_v33  ;;  %v3378_v43 = vsub.f32 %v3352_v18, %v3360_v33 }
0x1e94   :  { %v3366_v52 = vpop.xlane.xlu1 %3365  ;;  %v3359_v25 = vpop.xlane.xlu0 %3358 }
0x1e95   :  { %v3370_v32 = vmul.f32 0.015625, %v3366_v52  ;;  %v3361_v34 = vmul.f32 0.015625, %v3359_v25 }
0x1e97   :  { %v3374_v36 = vsub.f32 %v3370_v32, %v3372_v55  ;;  %v3373_v37 = vmul.f32 %v3361_v34, %v3361_v34  ;;  %v3379_v47 = vsub.f32 %v3353_v13, %v3361_v34 }
0x1e98   :  { %v3369_v8 = vpop.xlane.xlu0 %3368 }
0x1e99   :  { %v3376_v31 = vmax.f32 %v3374_v36, 0.0  ;;  %v3371_v38 = vmul.f32 0.015625, %v3369_v8 }
0x1e9b   :  { %v3380_v39 = vadd.f32 1e-12, %v3376_v31  ;;  %v3375_v2 = vsub.f32 %v3371_v38, %v3373_v37 }
0x1e9d   :  { %4256 = vrsqrt.f32 %v3380_v39  ;;  %v3377_v42 = vmax.f32 %v3375_v2, 0.0 }
0x1e9f   :  { %v3381_v4 = vadd.f32 1e-12, %v3377_v42 }
0x1ea1   :  { %4258 = vrsqrt.f32 %v3381_v4 }
0x1eaa   :  { %v4257_v45 = vpop.eup %4256 }
0x1eab   :  { %v3384_v44 = vmul.f32 %v4257_v45, %v3378_v43 }
0x1ead   :  { %v3390_v56 = vmul.f32 %v3389_v49, %v3384_v44 }
0x1eae   :  { %v4259_v50 = vpop.eup %4258 }
0x1eaf   :  { %v3385_v54 = vmul.f32 %v4259_v50, %v3379_v47  ;;  %v3396_v24 = vadd.f32 %v3591_v60, %v3390_v56 }
0x1eb1   :  { %v3391_v57 = vmul.f32 %v3389_v49, %v3385_v54 }
0x1eb3   :  { %v3397_v61 = vadd.f32 %v3591_v60, %v3391_v57 }
0x1eb5   :  { %v3400_v23 = vrot.slane %v3397_v61, 7 }
0x1eb7   :  { %v3402_v0 = vsel %vm3401_vm5, %v3400_v23, %v3396_v24 }
0x1eb8   :  { %3405 = vst.msk [vmem:[#allocation2] sm:$0x3] %vm3404_vm6, %v3402_v0 }
0x1eb9   :  { %4275 = shalt.err (!%p4272_p4)
}
0x1eba   :  { %3415 = dma.vmem_to_hbm [thread:$0]  %s3413_s15, 32, %s5164_s9, [#allocation3]  }
0x1ebb   :  { %4284 = dma.done.wait [#allocation3], 32  }
0x1ebc   :  { %4285 = vsyncadd [#allocation3], 4294967264 }
0x1ebd   :  { %3419 = vsyncpa [#allocation3], 1 }

</bundles_post_ra>
